<compile_context>
chip_gen: v7x
topology: tpu7x:2x2x1
jax: 0.10.0
libtpu: 0.0.40
codegen_flags: <defaults>
</compile_context>

<pallas_src>
import functools

import jax
import jax.numpy as jnp
from jax.experimental import pallas as pl
from jax.experimental.pallas import tpu as pltpu


def _round_up(n, m):
    return ((n + m - 1) // m) * m


def _lstm_fc_kernel(x_ref, wih_ref, whh_ref, b_ref, fcw_ref, fcb_ref,
                    out_ref, pre_ref, *, T, Bp, Hp):
    """Single-program kernel: LSTM (unrolled in time) + final Linear.

    x_ref  : (T*Bp, Ip)   f32   time-major, batch+lane padded input, flattened
    wih_ref: (Ip, 4*Hp)   f32   transposed weight_ih_l0, gates [i,f,o,g], g x2
    whh_ref: (Hp, 4*Hp)   f32   transposed weight_hh_l0, same layout
    b_ref  : (1, 4*Hp)    f32   bias_ih_l0 + bias_hh_l0, same layout
    fcw_ref: (Hp, Fp)     f32   transposed fc.weight, zero-padded
    fcb_ref: (1, Fp)      f32   fc.bias, zero-padded
    out_ref: (Bp, Fp)     f32
    pre_ref: (T*Bp, 4*Hp) f32   VMEM scratch for hoisted input projection
    """
    # 1) Hoisted input projection for all time steps at once, bias folded in.
    pre_ref[...] = (
        jnp.dot(x_ref[...], wih_ref[...], preferred_element_type=jnp.float32)
        + b_ref[...]
    )

    # 2) Recurrence: h/c live in registers, loop fully unrolled (T is small
    #    and static).  Only h @ W_hh + one sigmoid + one tanh(c) sit on the
    #    serial per-step chain.
    h = jnp.zeros((Bp, Hp), jnp.float32)
    c = jnp.zeros((Bp, Hp), jnp.float32)
    for t in range(T):
        gates = pre_ref[t * Bp:(t + 1) * Bp, :] + jnp.dot(
            h, whh_ref[...], preferred_element_type=jnp.float32)
        # Gate order is [i, f, o, g] with the g columns pre-scaled by 2, so a
        # single sigmoid covers all four gates; tanh(g) = 2*sigmoid(2g) - 1.
        s = jax.nn.sigmoid(gates)
        i_g = s[:, 0 * Hp:1 * Hp]
        f_g = s[:, 1 * Hp:2 * Hp]
        o_g = s[:, 2 * Hp:3 * Hp]
        g_g = 2.0 * s[:, 3 * Hp:4 * Hp] - 1.0
        c = f_g * c + i_g * g_g
        h = o_g * jnp.tanh(c)

    # 3) dropout(out[:, -1, :]) is identity in eval mode; fc on last hidden
    #    state.  Padded rows of fcw are zero (and padded h lanes are zero),
    #    so padded lanes of the output are exactly fcb's zero padding.
    out_ref[...] = (
        jnp.dot(h, fcw_ref[...], preferred_element_type=jnp.float32)
        + fcb_ref[...]
    )


def _prep_gate_matrix(w, H, Hp):
    """(rows, 4*H) in PyTorch order [i,f,g,o] -> (rows, 4*Hp) in [i,f,o,g].

    The g block is scaled by 2 so the kernel can use tanh(g) = 2*sigmoid(2g)-1.
    Padded columns of every gate block are zero, so padded hidden lanes stay
    exactly zero through the recurrence (sigmoid(0)=0.5, 2*0.5-1=0).
    """
    rows = w.shape[0]
    w4 = w.reshape(rows, 4, H)
    w4 = w4[:, jnp.array([0, 1, 3, 2]), :]                    # [i, f, o, g]
    scale = jnp.array([1.0, 1.0, 1.0, 2.0], jnp.float32).reshape(1, 4, 1)
    w4 = w4 * scale
    w4 = jnp.pad(w4, ((0, 0), (0, 0), (0, Hp - H)))
    return w4.reshape(rows, 4 * Hp)


def prepare_params(w_ih, w_hh, b_ih, b_hh, fc_w, fc_b):
    """One-time weight prep (hoisted out of the per-call path).

    Weight shapes follow PyTorch conventions:
      w_ih: (4H, I), w_hh: (4H, H), b_ih/b_hh: (4H,), fc_w: (F, H), fc_b: (F,)
    """
    fourH, I = w_ih.shape
    H = fourH // 4
    F = fc_w.shape[0]

    Hp = _round_up(H, 128)    # lane-aligned hidden size (50 -> 128)
    Ip = _round_up(I, 128)    # aligned contraction dim for the input proj
    Fp = _round_up(F, 128)    # lane-dense output (3 -> 128)

    f32 = jnp.float32

    wih_t = _prep_gate_matrix(jnp.transpose(w_ih).astype(f32), H, Hp)  # (I, 4Hp)
    wih_t = jnp.pad(wih_t, ((0, Ip - I), (0, 0)))                      # (Ip, 4Hp)
    whh_t = _prep_gate_matrix(jnp.transpose(w_hh).astype(f32), H, Hp)  # (H, 4Hp)
    whh_t = jnp.pad(whh_t, ((0, Hp - H), (0, 0)))                      # (Hp, 4Hp)
    b = _prep_gate_matrix((b_ih + b_hh).astype(f32).reshape(1, fourH), H, Hp)

    fcw_t = jnp.transpose(fc_w).astype(f32)                            # (H, F)
    fcw_t = jnp.pad(fcw_t, ((0, Hp - H), (0, Fp - F)))                 # (Hp, Fp)
    fcb = jnp.pad(fc_b.astype(f32).reshape(1, F), ((0, 0), (0, Fp - F)))

    params = (wih_t, whh_t, b, fcw_t, fcb)
    meta = dict(I=I, F=F, Hp=Hp, Ip=Ip, Fp=Fp)
    return params, meta


@functools.partial(jax.jit, static_argnames=("I", "F", "Hp", "Ip", "Fp"))
def multistep_lstm_forward(x, wih_t, whh_t, b, fcw_t, fcb, *, I, F, Hp, Ip, Fp):
    """x: (B, T, I) float32.  Returns (B, forecast_steps) float32."""
    B, T, _ = x.shape
    Bp = _round_up(max(B, 8), 8)    # full sublanes (2 -> 8)
    f32 = jnp.float32

    # (B, T, I) -> time-major, batch- & lane-padded, flattened (T*Bp, Ip)
    x_tbi = jnp.transpose(x, (1, 0, 2)).astype(f32)                 # (T, B, I)
    x_tbi = jnp.pad(x_tbi, ((0, 0), (0, Bp - B), (0, Ip - I)))      # (T, Bp, Ip)
    x2d = x_tbi.reshape(T * Bp, Ip)                                 # (T*Bp, Ip)

    vmem_spec = pl.BlockSpec(memory_space=pltpu.MemorySpace.VMEM)
    kernel = functools.partial(_lstm_fc_kernel, T=T, Bp=Bp, Hp=Hp)

    out_p = pl.pallas_call(
        kernel,
        out_shape=jax.ShapeDtypeStruct((Bp, Fp), f32),
        in_specs=[vmem_spec] * 6,
        out_specs=vmem_spec,
        scratch_shapes=[
            pltpu.VMEM((T * Bp, 4 * Hp), f32),   # hoisted pre-activations
        ],
    )(x2d, wih_t, whh_t, b, fcw_t, fcb)

    return out_p[:B, :F]


def _reference_forward(x, w_ih, w_hh, b_ih, b_hh, fc_w, fc_b):
    """Pure-JAX reference mirroring torch.nn.LSTM (1 layer) + Linear."""
    B, T, I = x.shape
    H = w_ih.shape[0] // 4
    h = jnp.zeros((B, H), jnp.float32)
    c = jnp.zeros((B, H), jnp.float32)
    for t in range(T):
        g = x[:, t, :] @ w_ih.T + h @ w_hh.T + b_ih + b_hh
        i_g = jax.nn.sigmoid(g[:, 0 * H:1 * H])
        f_g = jax.nn.sigmoid(g[:, 1 * H:2 * H])
        g_g = jnp.tanh(g[:, 2 * H:3 * H])
        o_g = jax.nn.sigmoid(g[:, 3 * H:4 * H])
        c = f_g * c + i_g * g_g
        h = o_g * jnp.tanh(c)
    return h @ fc_w.T + fc_b


if __name__ == "__main__":
    # Module hyperparameters (defaults from MultiStepLSTMModel.__init__)
    input_size = 7
    hidden_size = 50
    forecast_steps = 3

    # Small deterministic example shapes
    batch, seq_len = 2, 8

    key = jax.random.PRNGKey(0)
    keys = jax.random.split(key, 8)
    k = 1.0 / jnp.sqrt(hidden_size)

    # Deterministic, PyTorch-shaped parameter init (uniform(-1/sqrt(H), 1/sqrt(H)))
    w_ih = jax.random.uniform(keys[0], (4 * hidden_size, input_size),
                              jnp.float32, -k, k)
    w_hh = jax.random.uniform(keys[1], (4 * hidden_size, hidden_size),
                              jnp.float32, -k, k)
    b_ih = jax.random.uniform(keys[2], (4 * hidden_size,), jnp.float32, -k, k)
    b_hh = jax.random.uniform(keys[3], (4 * hidden_size,), jnp.float32, -k, k)
    fc_w = jax.random.uniform(keys[4], (forecast_steps, hidden_size),
                              jnp.float32, -k, k)
    fc_b = jax.random.uniform(keys[5], (forecast_steps,), jnp.float32, -k, k)

    x = jax.random.normal(keys[6], (batch, seq_len, input_size), jnp.float32)

    # One-time weight prep (hoisted out of the per-call path).
    params, meta = prepare_params(w_ih, w_hh, b_ih, b_hh, fc_w, fc_b)
    params = jax.block_until_ready(params)

    out = multistep_lstm_forward(x, *params, **meta)
    out = jax.block_until_ready(out)

    ref = _reference_forward(x, w_ih, w_hh, b_ih, b_hh, fc_w, fc_b)
    assert out.shape == (batch, forecast_steps)
    assert jnp.allclose(out, ref, atol=1e-4, rtol=1e-4), (out, ref)

    print("KERNEL_OK")
</pallas_src>

<mosaic_0001>
module attributes {stable_mosaic.version = 11 : i64} {
  func.func @_lstm_fc_kernel(%arg0: memref<64x128xf32, #tpu.memory_space<vmem>>, %arg1: memref<128x512xf32, #tpu.memory_space<vmem>>, %arg2: memref<128x512xf32, #tpu.memory_space<vmem>>, %arg3: memref<1x512xf32, #tpu.memory_space<vmem>>, %arg4: memref<128x128xf32, #tpu.memory_space<vmem>>, %arg5: memref<1x128xf32, #tpu.memory_space<vmem>>, %arg6: memref<8x128xf32, #tpu.memory_space<vmem>>, %arg7: memref<64x512xf32, #tpu.memory_space<vmem>>) attributes {dimension_semantics = [], scalar_prefetch = 0 : i64, scratch_operands = 1 : i64, tpu.core_type = #tpu.core_type<tc>} {
    %c0 = arith.constant 0 : index
    %c0_0 = arith.constant 0 : index
    %0 = vector.load %arg0[%c0, %c0_0] : memref<64x128xf32, #tpu.memory_space<vmem>>, vector<64x128xf32>
    %c0_1 = arith.constant 0 : index
    %c0_2 = arith.constant 0 : index
    %1 = vector.load %arg1[%c0_1, %c0_2] : memref<128x512xf32, #tpu.memory_space<vmem>>, vector<128x512xf32>
    %cst = arith.constant dense<0.000000e+00> : vector<64x512xf32>
    %2 = tpu.matmul %0, %1, %cst {dimension_numbers = #tpu.dot_dimension_numbers<[1], [0], [0], [1], [0, 0, 1, 1], [], []>} : vector<64x128xf32>, vector<128x512xf32>, vector<64x512xf32> -> vector<64x512xf32>
    %c0_3 = arith.constant 0 : index
    %c0_4 = arith.constant 0 : index
    %3 = vector.load %arg3[%c0_3, %c0_4] : memref<1x512xf32, #tpu.memory_space<vmem>>, vector<1x512xf32>
    %4 = vector.broadcast %3 : vector<1x512xf32> to vector<64x512xf32>
    %5 = arith.addf %2, %4 : vector<64x512xf32>
    %c0_5 = arith.constant 0 : index
    %c0_6 = arith.constant 0 : index
    %6 = vector.load %arg7[%c0_5, %c0_6] : memref<64x512xf32, #tpu.memory_space<vmem>>, vector<64x512xf32>
    tpu.vector_store %arg7[%c0_5, %c0_6], %5 {strides = array<i32>} : memref<64x512xf32, #tpu.memory_space<vmem>>, vector<64x512xf32>,
    %cst_7 = arith.constant 0.000000e+00 : f32
    %7 = vector.broadcast %cst_7 : f32 to vector<8x128xf32>
    %cst_8 = arith.constant 0.000000e+00 : f32
    %8 = vector.broadcast %cst_8 : f32 to vector<8x128xf32>
    %c0_9 = arith.constant 0 : index
    %c0_10 = arith.constant 0 : index
    %9 = vector.load %arg7[%c0_9, %c0_10] : memref<64x512xf32, #tpu.memory_space<vmem>>, vector<8x512xf32>
    %c0_11 = arith.constant 0 : index
    %c0_12 = arith.constant 0 : index
    %10 = vector.load %arg2[%c0_11, %c0_12] : memref<128x512xf32, #tpu.memory_space<vmem>>, vector<128x512xf32>
    %cst_13 = arith.constant dense<0.000000e+00> : vector<8x512xf32>
    %11 = tpu.matmul %7, %10, %cst_13 {dimension_numbers = #tpu.dot_dimension_numbers<[1], [0], [0], [1], [0, 0, 1, 1], [], []>} : vector<8x128xf32>, vector<128x512xf32>, vector<8x512xf32> -> vector<8x512xf32>
    %12 = arith.addf %9, %11 : vector<8x512xf32>
    %13 = arith.negf %12 : vector<8x512xf32>
    %14 = math.exp %13 : vector<8x512xf32>
    %cst_14 = arith.constant 1.000000e+00 : f32
    %15 = vector.broadcast %cst_14 : f32 to vector<8x512xf32>
    %16 = arith.addf %15, %14 : vector<8x512xf32>
    %17 = arith.divf %15, %16 : vector<8x512xf32>
    %18 = vector.extract_strided_slice %17 {offsets = [0, 0], sizes = [8, 128], strides = [1, 1]} : vector<8x512xf32> to vector<8x128xf32>
    %19 = vector.extract_strided_slice %17 {offsets = [0, 128], sizes = [8, 128], strides = [1, 1]} : vector<8x512xf32> to vector<8x128xf32>
    %20 = vector.extract_strided_slice %17 {offsets = [0, 256], sizes = [8, 128], strides = [1, 1]} : vector<8x512xf32> to vector<8x128xf32>
    %21 = vector.extract_strided_slice %17 {offsets = [0, 384], sizes = [8, 128], strides = [1, 1]} : vector<8x512xf32> to vector<8x128xf32>
    %cst_15 = arith.constant 2.000000e+00 : f32
    %22 = vector.broadcast %cst_15 : f32 to vector<8x128xf32>
    %23 = arith.mulf %22, %21 : vector<8x128xf32>
    %cst_16 = arith.constant 1.000000e+00 : f32
    %24 = vector.broadcast %cst_16 : f32 to vector<8x128xf32>
    %25 = arith.subf %23, %24 : vector<8x128xf32>
    %26 = arith.mulf %19, %8 : vector<8x128xf32>
    %27 = arith.mulf %18, %25 : vector<8x128xf32>
    %28 = arith.addf %26, %27 : vector<8x128xf32>
    %29 = math.tanh %28 : vector<8x128xf32>
    %30 = arith.mulf %20, %29 : vector<8x128xf32>
    %c8 = arith.constant 8 : index
    %c0_17 = arith.constant 0 : index
    %31 = vector.load %arg7[%c8, %c0_17] : memref<64x512xf32, #tpu.memory_space<vmem>>, vector<8x512xf32>
    %c0_18 = arith.constant 0 : index
    %c0_19 = arith.constant 0 : index
    %32 = vector.load %arg2[%c0_18, %c0_19] : memref<128x512xf32, #tpu.memory_space<vmem>>, vector<128x512xf32>
    %cst_20 = arith.constant dense<0.000000e+00> : vector<8x512xf32>
    %33 = tpu.matmul %30, %32, %cst_20 {dimension_numbers = #tpu.dot_dimension_numbers<[1], [0], [0], [1], [0, 0, 1, 1], [], []>} : vector<8x128xf32>, vector<128x512xf32>, vector<8x512xf32> -> vector<8x512xf32>
    %34 = arith.addf %31, %33 : vector<8x512xf32>
    %35 = arith.negf %34 : vector<8x512xf32>
    %36 = math.exp %35 : vector<8x512xf32>
    %cst_21 = arith.constant 1.000000e+00 : f32
    %37 = vector.broadcast %cst_21 : f32 to vector<8x512xf32>
    %38 = arith.addf %37, %36 : vector<8x512xf32>
    %39 = arith.divf %37, %38 : vector<8x512xf32>
    %40 = vector.extract_strided_slice %39 {offsets = [0, 0], sizes = [8, 128], strides = [1, 1]} : vector<8x512xf32> to vector<8x128xf32>
    %41 = vector.extract_strided_slice %39 {offsets = [0, 128], sizes = [8, 128], strides = [1, 1]} : vector<8x512xf32> to vector<8x128xf32>
    %42 = vector.extract_strided_slice %39 {offsets = [0, 256], sizes = [8, 128], strides = [1, 1]} : vector<8x512xf32> to vector<8x128xf32>
    %43 = vector.extract_strided_slice %39 {offsets = [0, 384], sizes = [8, 128], strides = [1, 1]} : vector<8x512xf32> to vector<8x128xf32>
    %cst_22 = arith.constant 2.000000e+00 : f32
    %44 = vector.broadcast %cst_22 : f32 to vector<8x128xf32>
    %45 = arith.mulf %44, %43 : vector<8x128xf32>
    %cst_23 = arith.constant 1.000000e+00 : f32
    %46 = vector.broadcast %cst_23 : f32 to vector<8x128xf32>
    %47 = arith.subf %45, %46 : vector<8x128xf32>
    %48 = arith.mulf %41, %28 : vector<8x128xf32>
    %49 = arith.mulf %40, %47 : vector<8x128xf32>
    %50 = arith.addf %48, %49 : vector<8x128xf32>
    %51 = math.tanh %50 : vector<8x128xf32>
    %52 = arith.mulf %42, %51 : vector<8x128xf32>
    %c16 = arith.constant 16 : index
    %c0_24 = arith.constant 0 : index
    %53 = vector.load %arg7[%c16, %c0_24] : memref<64x512xf32, #tpu.memory_space<vmem>>, vector<8x512xf32>
    %c0_25 = arith.constant 0 : index
    %c0_26 = arith.constant 0 : index
    %54 = vector.load %arg2[%c0_25, %c0_26] : memref<128x512xf32, #tpu.memory_space<vmem>>, vector<128x512xf32>
    %cst_27 = arith.constant dense<0.000000e+00> : vector<8x512xf32>
    %55 = tpu.matmul %52, %54, %cst_27 {dimension_numbers = #tpu.dot_dimension_numbers<[1], [0], [0], [1], [0, 0, 1, 1], [], []>} : vector<8x128xf32>, vector<128x512xf32>, vector<8x512xf32> -> vector<8x512xf32>
    %56 = arith.addf %53, %55 : vector<8x512xf32>
    %57 = arith.negf %56 : vector<8x512xf32>
    %58 = math.exp %57 : vector<8x512xf32>
    %cst_28 = arith.constant 1.000000e+00 : f32
    %59 = vector.broadcast %cst_28 : f32 to vector<8x512xf32>
    %60 = arith.addf %59, %58 : vector<8x512xf32>
    %61 = arith.divf %59, %60 : vector<8x512xf32>
    %62 = vector.extract_strided_slice %61 {offsets = [0, 0], sizes = [8, 128], strides = [1, 1]} : vector<8x512xf32> to vector<8x128xf32>
    %63 = vector.extract_strided_slice %61 {offsets = [0, 128], sizes = [8, 128], strides = [1, 1]} : vector<8x512xf32> to vector<8x128xf32>
    %64 = vector.extract_strided_slice %61 {offsets = [0, 256], sizes = [8, 128], strides = [1, 1]} : vector<8x512xf32> to vector<8x128xf32>
    %65 = vector.extract_strided_slice %61 {offsets = [0, 384], sizes = [8, 128], strides = [1, 1]} : vector<8x512xf32> to vector<8x128xf32>
    %cst_29 = arith.constant 2.000000e+00 : f32
    %66 = vector.broadcast %cst_29 : f32 to vector<8x128xf32>
    %67 = arith.mulf %66, %65 : vector<8x128xf32>
    %cst_30 = arith.constant 1.000000e+00 : f32
    %68 = vector.broadcast %cst_30 : f32 to vector<8x128xf32>
    %69 = arith.subf %67, %68 : vector<8x128xf32>
    %70 = arith.mulf %63, %50 : vector<8x128xf32>
    %71 = arith.mulf %62, %69 : vector<8x128xf32>
    %72 = arith.addf %70, %71 : vector<8x128xf32>
    %73 = math.tanh %72 : vector<8x128xf32>
    %74 = arith.mulf %64, %73 : vector<8x128xf32>
    %c24 = arith.constant 24 : index
    %c0_31 = arith.constant 0 : index
    %75 = vector.load %arg7[%c24, %c0_31] : memref<64x512xf32, #tpu.memory_space<vmem>>, vector<8x512xf32>
    %c0_32 = arith.constant 0 : index
    %c0_33 = arith.constant 0 : index
    %76 = vector.load %arg2[%c0_32, %c0_33] : memref<128x512xf32, #tpu.memory_space<vmem>>, vector<128x512xf32>
    %cst_34 = arith.constant dense<0.000000e+00> : vector<8x512xf32>
    %77 = tpu.matmul %74, %76, %cst_34 {dimension_numbers = #tpu.dot_dimension_numbers<[1], [0], [0], [1], [0, 0, 1, 1], [], []>} : vector<8x128xf32>, vector<128x512xf32>, vector<8x512xf32> -> vector<8x512xf32>
    %78 = arith.addf %75, %77 : vector<8x512xf32>
    %79 = arith.negf %78 : vector<8x512xf32>
    %80 = math.exp %79 : vector<8x512xf32>
    %cst_35 = arith.constant 1.000000e+00 : f32
    %81 = vector.broadcast %cst_35 : f32 to vector<8x512xf32>
    %82 = arith.addf %81, %80 : vector<8x512xf32>
    %83 = arith.divf %81, %82 : vector<8x512xf32>
    %84 = vector.extract_strided_slice %83 {offsets = [0, 0], sizes = [8, 128], strides = [1, 1]} : vector<8x512xf32> to vector<8x128xf32>
    %85 = vector.extract_strided_slice %83 {offsets = [0, 128], sizes = [8, 128], strides = [1, 1]} : vector<8x512xf32> to vector<8x128xf32>
    %86 = vector.extract_strided_slice %83 {offsets = [0, 256], sizes = [8, 128], strides = [1, 1]} : vector<8x512xf32> to vector<8x128xf32>
    %87 = vector.extract_strided_slice %83 {offsets = [0, 384], sizes = [8, 128], strides = [1, 1]} : vector<8x512xf32> to vector<8x128xf32>
    %cst_36 = arith.constant 2.000000e+00 : f32
    %88 = vector.broadcast %cst_36 : f32 to vector<8x128xf32>
    %89 = arith.mulf %88, %87 : vector<8x128xf32>
    %cst_37 = arith.constant 1.000000e+00 : f32
    %90 = vector.broadcast %cst_37 : f32 to vector<8x128xf32>
    %91 = arith.subf %89, %90 : vector<8x128xf32>
    %92 = arith.mulf %85, %72 : vector<8x128xf32>
    %93 = arith.mulf %84, %91 : vector<8x128xf32>
    %94 = arith.addf %92, %93 : vector<8x128xf32>
    %95 = math.tanh %94 : vector<8x128xf32>
    %96 = arith.mulf %86, %95 : vector<8x128xf32>
    %c32 = arith.constant 32 : index
    %c0_38 = arith.constant 0 : index
    %97 = vector.load %arg7[%c32, %c0_38] : memref<64x512xf32, #tpu.memory_space<vmem>>, vector<8x512xf32>
    %c0_39 = arith.constant 0 : index
    %c0_40 = arith.constant 0 : index
    %98 = vector.load %arg2[%c0_39, %c0_40] : memref<128x512xf32, #tpu.memory_space<vmem>>, vector<128x512xf32>
    %cst_41 = arith.constant dense<0.000000e+00> : vector<8x512xf32>
    %99 = tpu.matmul %96, %98, %cst_41 {dimension_numbers = #tpu.dot_dimension_numbers<[1], [0], [0], [1], [0, 0, 1, 1], [], []>} : vector<8x128xf32>, vector<128x512xf32>, vector<8x512xf32> -> vector<8x512xf32>
    %100 = arith.addf %97, %99 : vector<8x512xf32>
    %101 = arith.negf %100 : vector<8x512xf32>
    %102 = math.exp %101 : vector<8x512xf32>
    %cst_42 = arith.constant 1.000000e+00 : f32
    %103 = vector.broadcast %cst_42 : f32 to vector<8x512xf32>
    %104 = arith.addf %103, %102 : vector<8x512xf32>
    %105 = arith.divf %103, %104 : vector<8x512xf32>
    %106 = vector.extract_strided_slice %105 {offsets = [0, 0], sizes = [8, 128], strides = [1, 1]} : vector<8x512xf32> to vector<8x128xf32>
    %107 = vector.extract_strided_slice %105 {offsets = [0, 128], sizes = [8, 128], strides = [1, 1]} : vector<8x512xf32> to vector<8x128xf32>
    %108 = vector.extract_strided_slice %105 {offsets = [0, 256], sizes = [8, 128], strides = [1, 1]} : vector<8x512xf32> to vector<8x128xf32>
    %109 = vector.extract_strided_slice %105 {offsets = [0, 384], sizes = [8, 128], strides = [1, 1]} : vector<8x512xf32> to vector<8x128xf32>
    %cst_43 = arith.constant 2.000000e+00 : f32
    %110 = vector.broadcast %cst_43 : f32 to vector<8x128xf32>
    %111 = arith.mulf %110, %109 : vector<8x128xf32>
    %cst_44 = arith.constant 1.000000e+00 : f32
    %112 = vector.broadcast %cst_44 : f32 to vector<8x128xf32>
    %113 = arith.subf %111, %112 : vector<8x128xf32>
    %114 = arith.mulf %107, %94 : vector<8x128xf32>
    %115 = arith.mulf %106, %113 : vector<8x128xf32>
    %116 = arith.addf %114, %115 : vector<8x128xf32>
    %117 = math.tanh %116 : vector<8x128xf32>
    %118 = arith.mulf %108, %117 : vector<8x128xf32>
    %c40 = arith.constant 40 : index
    %c0_45 = arith.constant 0 : index
    %119 = vector.load %arg7[%c40, %c0_45] : memref<64x512xf32, #tpu.memory_space<vmem>>, vector<8x512xf32>
    %c0_46 = arith.constant 0 : index
    %c0_47 = arith.constant 0 : index
    %120 = vector.load %arg2[%c0_46, %c0_47] : memref<128x512xf32, #tpu.memory_space<vmem>>, vector<128x512xf32>
    %cst_48 = arith.constant dense<0.000000e+00> : vector<8x512xf32>
    %121 = tpu.matmul %118, %120, %cst_48 {dimension_numbers = #tpu.dot_dimension_numbers<[1], [0], [0], [1], [0, 0, 1, 1], [], []>} : vector<8x128xf32>, vector<128x512xf32>, vector<8x512xf32> -> vector<8x512xf32>
    %122 = arith.addf %119, %121 : vector<8x512xf32>
    %123 = arith.negf %122 : vector<8x512xf32>
    %124 = math.exp %123 : vector<8x512xf32>
    %cst_49 = arith.constant 1.000000e+00 : f32
    %125 = vector.broadcast %cst_49 : f32 to vector<8x512xf32>
    %126 = arith.addf %125, %124 : vector<8x512xf32>
    %127 = arith.divf %125, %126 : vector<8x512xf32>
    %128 = vector.extract_strided_slice %127 {offsets = [0, 0], sizes = [8, 128], strides = [1, 1]} : vector<8x512xf32> to vector<8x128xf32>
    %129 = vector.extract_strided_slice %127 {offsets = [0, 128], sizes = [8, 128], strides = [1, 1]} : vector<8x512xf32> to vector<8x128xf32>
    %130 = vector.extract_strided_slice %127 {offsets = [0, 256], sizes = [8, 128], strides = [1, 1]} : vector<8x512xf32> to vector<8x128xf32>
    %131 = vector.extract_strided_slice %127 {offsets = [0, 384], sizes = [8, 128], strides = [1, 1]} : vector<8x512xf32> to vector<8x128xf32>
    %cst_50 = arith.constant 2.000000e+00 : f32
    %132 = vector.broadcast %cst_50 : f32 to vector<8x128xf32>
    %133 = arith.mulf %132, %131 : vector<8x128xf32>
    %cst_51 = arith.constant 1.000000e+00 : f32
    %134 = vector.broadcast %cst_51 : f32 to vector<8x128xf32>
    %135 = arith.subf %133, %134 : vector<8x128xf32>
    %136 = arith.mulf %129, %116 : vector<8x128xf32>
    %137 = arith.mulf %128, %135 : vector<8x128xf32>
    %138 = arith.addf %136, %137 : vector<8x128xf32>
    %139 = math.tanh %138 : vector<8x128xf32>
    %140 = arith.mulf %130, %139 : vector<8x128xf32>
    %c48 = arith.constant 48 : index
    %c0_52 = arith.constant 0 : index
    %141 = vector.load %arg7[%c48, %c0_52] : memref<64x512xf32, #tpu.memory_space<vmem>>, vector<8x512xf32>
    %c0_53 = arith.constant 0 : index
    %c0_54 = arith.constant 0 : index
    %142 = vector.load %arg2[%c0_53, %c0_54] : memref<128x512xf32, #tpu.memory_space<vmem>>, vector<128x512xf32>
    %cst_55 = arith.constant dense<0.000000e+00> : vector<8x512xf32>
    %143 = tpu.matmul %140, %142, %cst_55 {dimension_numbers = #tpu.dot_dimension_numbers<[1], [0], [0], [1], [0, 0, 1, 1], [], []>} : vector<8x128xf32>, vector<128x512xf32>, vector<8x512xf32> -> vector<8x512xf32>
    %144 = arith.addf %141, %143 : vector<8x512xf32>
    %145 = arith.negf %144 : vector<8x512xf32>
    %146 = math.exp %145 : vector<8x512xf32>
    %cst_56 = arith.constant 1.000000e+00 : f32
    %147 = vector.broadcast %cst_56 : f32 to vector<8x512xf32>
    %148 = arith.addf %147, %146 : vector<8x512xf32>
    %149 = arith.divf %147, %148 : vector<8x512xf32>
    %150 = vector.extract_strided_slice %149 {offsets = [0, 0], sizes = [8, 128], strides = [1, 1]} : vector<8x512xf32> to vector<8x128xf32>
    %151 = vector.extract_strided_slice %149 {offsets = [0, 128], sizes = [8, 128], strides = [1, 1]} : vector<8x512xf32> to vector<8x128xf32>
    %152 = vector.extract_strided_slice %149 {offsets = [0, 256], sizes = [8, 128], strides = [1, 1]} : vector<8x512xf32> to vector<8x128xf32>
    %153 = vector.extract_strided_slice %149 {offsets = [0, 384], sizes = [8, 128], strides = [1, 1]} : vector<8x512xf32> to vector<8x128xf32>
    %cst_57 = arith.constant 2.000000e+00 : f32
    %154 = vector.broadcast %cst_57 : f32 to vector<8x128xf32>
    %155 = arith.mulf %154, %153 : vector<8x128xf32>
    %cst_58 = arith.constant 1.000000e+00 : f32
    %156 = vector.broadcast %cst_58 : f32 to vector<8x128xf32>
    %157 = arith.subf %155, %156 : vector<8x128xf32>
    %158 = arith.mulf %151, %138 : vector<8x128xf32>
    %159 = arith.mulf %150, %157 : vector<8x128xf32>
    %160 = arith.addf %158, %159 : vector<8x128xf32>
    %161 = math.tanh %160 : vector<8x128xf32>
    %162 = arith.mulf %152, %161 : vector<8x128xf32>
    %c56 = arith.constant 56 : index
    %c0_59 = arith.constant 0 : index
    %163 = vector.load %arg7[%c56, %c0_59] : memref<64x512xf32, #tpu.memory_space<vmem>>, vector<8x512xf32>
    %c0_60 = arith.constant 0 : index
    %c0_61 = arith.constant 0 : index
    %164 = vector.load %arg2[%c0_60, %c0_61] : memref<128x512xf32, #tpu.memory_space<vmem>>, vector<128x512xf32>
    %cst_62 = arith.constant dense<0.000000e+00> : vector<8x512xf32>
    %165 = tpu.matmul %162, %164, %cst_62 {dimension_numbers = #tpu.dot_dimension_numbers<[1], [0], [0], [1], [0, 0, 1, 1], [], []>} : vector<8x128xf32>, vector<128x512xf32>, vector<8x512xf32> -> vector<8x512xf32>
    %166 = arith.addf %163, %165 : vector<8x512xf32>
    %167 = arith.negf %166 : vector<8x512xf32>
    %168 = math.exp %167 : vector<8x512xf32>
    %cst_63 = arith.constant 1.000000e+00 : f32
    %169 = vector.broadcast %cst_63 : f32 to vector<8x512xf32>
    %170 = arith.addf %169, %168 : vector<8x512xf32>
    %171 = arith.divf %169, %170 : vector<8x512xf32>
    %172 = vector.extract_strided_slice %171 {offsets = [0, 0], sizes = [8, 128], strides = [1, 1]} : vector<8x512xf32> to vector<8x128xf32>
    %173 = vector.extract_strided_slice %171 {offsets = [0, 128], sizes = [8, 128], strides = [1, 1]} : vector<8x512xf32> to vector<8x128xf32>
    %174 = vector.extract_strided_slice %171 {offsets = [0, 256], sizes = [8, 128], strides = [1, 1]} : vector<8x512xf32> to vector<8x128xf32>
    %175 = vector.extract_strided_slice %171 {offsets = [0, 384], sizes = [8, 128], strides = [1, 1]} : vector<8x512xf32> to vector<8x128xf32>
    %cst_64 = arith.constant 2.000000e+00 : f32
    %176 = vector.broadcast %cst_64 : f32 to vector<8x128xf32>
    %177 = arith.mulf %176, %175 : vector<8x128xf32>
    %cst_65 = arith.constant 1.000000e+00 : f32
    %178 = vector.broadcast %cst_65 : f32 to vector<8x128xf32>
    %179 = arith.subf %177, %178 : vector<8x128xf32>
    %180 = arith.mulf %173, %160 : vector<8x128xf32>
    %181 = arith.mulf %172, %179 : vector<8x128xf32>
    %182 = arith.addf %180, %181 : vector<8x128xf32>
    %183 = math.tanh %182 : vector<8x128xf32>
    %184 = arith.mulf %174, %183 : vector<8x128xf32>
    %c0_66 = arith.constant 0 : index
    %c0_67 = arith.constant 0 : index
    %185 = vector.load %arg4[%c0_66, %c0_67] : memref<128x128xf32, #tpu.memory_space<vmem>>, vector<128x128xf32>
    %cst_68 = arith.constant dense<0.000000e+00> : vector<8x128xf32>
    %186 = tpu.matmul %184, %185, %cst_68 {dimension_numbers = #tpu.dot_dimension_numbers<[1], [0], [0], [1], [0, 0, 1, 1], [], []>} : vector<8x128xf32>, vector<128x128xf32>, vector<8x128xf32> -> vector<8x128xf32>
    %c0_69 = arith.constant 0 : index
    %c0_70 = arith.constant 0 : index
    %187 = vector.load %arg5[%c0_69, %c0_70] : memref<1x128xf32, #tpu.memory_space<vmem>>, vector<1x128xf32>
    %188 = vector.broadcast %187 : vector<1x128xf32> to vector<8x128xf32>
    %189 = arith.addf %186, %188 : vector<8x128xf32>
    %c0_71 = arith.constant 0 : index
    %c0_72 = arith.constant 0 : index
    %190 = vector.load %arg6[%c0_71, %c0_72] : memref<8x128xf32, #tpu.memory_space<vmem>>, vector<8x128xf32>
    tpu.vector_store %arg6[%c0_71, %c0_72], %189 {strides = array<i32>} : memref<8x128xf32, #tpu.memory_space<vmem>>, vector<8x128xf32>,
    return
  }
}

</mosaic_0001>

<bundles_post_ra>
// kernel: multistep_lstm_forward.1
= control target key start
LH: loop header
LB: loop body
LE: loop exit
PB: predicated region body
PF: predicated region fallthrough
CT: control target
= control target key end

     0   :  { %11 = vsyncpa [#allocation4], 0  ;;  %s3592_s0 = inlined_call_operand.vmem [shape: f32[64,128], index: 0, kind: input, shape index: {}]   ;;  %s3593_s1 = inlined_call_operand.hbm [shape: f32[128,512], index: 1, kind: input, shape index: {}]   ;;  %s3594_s2 = inlined_call_operand.hbm [shape: f32[128,512], index: 2, kind: input, shape index: {}]   ;;  %s3595_s3 = inlined_call_operand.hbm [shape: f32[1,512], index: 3, kind: input, shape index: {}]   ;;  %s3596_s4 = inlined_call_operand.vmem [shape: f32[128,128], index: 4, kind: input, shape index: {}]   ;;  %s3597_s5 = inlined_call_operand.vmem [shape: f32[1,128], index: 5, kind: input, shape index: {}]   ;;  %s3598_s6 = inlined_call_operand.vmem [shape: f32[8,128], index: 6, kind: output, shape index: {}]  }
   0x1   :  { %12 = vsyncpa [#allocation6], 0  ;;  %s3005_s21 = smov [#allocation5]   ;;  %s3006_s23 = smov [#allocation3]  }
   0x2   :  { %s32_s22 = sshll.u32 %s3005_s21, 4  ;;  %s20_s24 = sshll.u32 %s3006_s23, 4  ;;  %s33_s22 = int_to_ptr.vmem [resolvable:$true] %s32_s22  ;;  %s3048_s24 = int_to_ptr.vmem [resolvable:$true] %s20_s24 }
   0x3   :  { %s2935_s27 = scalar_lea.hbm %s3594_s2, 8192 }
   0x4   :  { %p2936_p0 = scmp.ne.s32.totalorder %s3594_s2, %s2935_s27  ;;  %p2939_p1 = scmp.lt.u32.totalorder %s2935_s27, %s3594_s2 }
   0x6   :  { %p2941_p2 = pnand %p2939_p1, %p2936_p0 }
   0x8   :  { %2944 = shalt.err (!%p2941_p2)
}
   0x9   :  { %s2945_s8 = scalar_lea.vmem %s33_s22, 8192  ;;  %p2950_p4 = scmp.lt.s32.totalorder %s33_s22, %s33_s22 }
   0xa   :  { %p2946_p3 = scmp.ne.s32.totalorder %s33_s22, %s2945_s8  ;;  %p2951_p5 = scmp.lt.s32.totalorder %s2945_s8, %s2945_s8 }
   0xc   :  { %p2952_p6 = por %p2951_p5, %p2950_p4 }
   0xe   :  { %p2953_p7 = pnand %p2952_p6, %p2946_p3 }
  0x10   :  { %2956 = shalt.err (!%p2953_p7)
}
  0x11   :  { %s3007_s9 = smov 512   ;;  %s3008_s10 = smov 32  }
  0x12   :  { %38 = dma.hbm_to_vmem [thread:$0]  %s3594_s2, 8192, %s33_s22, [#allocation6], %s3007_s9, %s3007_s9, %s3008_s10  }
  0x13   :  { %s2957_s15 = scalar_lea.hbm %s3593_s1, 8192 }
  0x14   :  { %p2958_p8 = scmp.ne.s32.totalorder %s3593_s1, %s2957_s15  ;;  %p2961_p9 = scmp.lt.u32.totalorder %s2957_s15, %s3593_s1 }
  0x16   :  { %p2963_p10 = pnand %p2961_p9, %p2958_p8 }
  0x18   :  { %2966 = shalt.err (!%p2963_p10)
}
  0x19   :  { %s2967_s20 = scalar_lea.vmem %s3048_s24, 8192  ;;  %p2972_p12 = scmp.lt.s32.totalorder %s3048_s24, %s3048_s24 }
  0x1a   :  { %p2968_p11 = scmp.ne.s32.totalorder %s3048_s24, %s2967_s20  ;;  %p2973_p13 = scmp.lt.s32.totalorder %s2967_s20, %s2967_s20 }
  0x1c   :  { %p2974_p0 = por %p2973_p13, %p2972_p12 }
  0x1e   :  { %p2975_p1 = pnand %p2974_p0, %p2968_p11 }
  0x20   :  { %2978 = shalt.err (!%p2975_p1)
}
  0x21   :  { %26 = dma.hbm_to_vmem [thread:$0]  %s3593_s1, 8192, %s3048_s24, [#allocation4], %s3007_s9, %s3007_s9, %s3008_s10  }
  0x22   :  { %s3009_s22 = smov [#allocation7]   ;;  %s2979_s27 = scalar_lea.hbm %s3595_s3, 64 }
  0x23   :  { %s45_s23 = sshll.u32 %s3009_s22, 4  ;;  %p2980_p2 = scmp.ne.s32.totalorder %s3595_s3, %s2979_s27  ;;  %s46_s23 = int_to_ptr.vmem [resolvable:$true] %s45_s23 }
  0x24   :  { %p2983_p3 = scmp.lt.u32.totalorder %s2979_s27, %s3595_s3 }
  0x26   :  { %p2985_p4 = pnand %p2983_p3, %p2980_p2 }
  0x28   :  { %2988 = shalt.err (!%p2985_p4)
}
  0x29   :  { %s2989_s8 = scalar_lea.vmem %s46_s23, 64  ;;  %p2994_p6 = scmp.lt.s32.totalorder %s46_s23, %s46_s23 }
  0x2a   :  { %p2990_p5 = scmp.ne.s32.totalorder %s46_s23, %s2989_s8  ;;  %p2995_p7 = scmp.lt.s32.totalorder %s2989_s8, %s2989_s8 }
  0x2c   :  { %p2996_p8 = por %p2995_p7, %p2994_p6 }
  0x2e   :  { %p2997_p9 = pnand %p2996_p8, %p2990_p5 }
  0x30   :  { %3000 = shalt.err (!%p2997_p9)
}
  0x31   :  { %48 = dma.hbm_to_vmem [thread:$0]  %s3595_s3, 64, %s46_s23, [#allocation6]  }
  0x32   :  { %3001 = dma.done.wait [#allocation4], 8192  }
  0x33   :  { %3002 = vsyncadd [#allocation4], 4294959104 }
  0x34   :  { %3003 = dma.done.wait [#allocation6], 8256  }
  0x35   :  { %3004 = vsyncadd [#allocation6], 4294959040  ;;  %v3010_v0 = vmov 0.0   ;;  %v71_v1 = vld [vmem:[#allocation3 + $0x8] sm:$0xff]  ;;  %v73_v3 = vld [vmem:[#allocation3 + $0x18] sm:$0xff]  ;;  %vm3012_vm0 = vmmov 0  }
  0x36   :  { %220 = vmatprep.mubr.f32.mxu0 %v3010_v0  ;;  %333 = vmatprep.mubr.f32.mxu1 %v3010_v0  ;;  %v75_v2 = vld [vmem:[#allocation3 + $0x28] sm:$0xff]  ;;  %v77_v5 = vld [vmem:[#allocation3 + $0x38] sm:$0xff]  ;;  %v70_v6 = vld [vmem:[#allocation3] sm:$0xff] }
  0x37   :  { %v2119_v4 = vpack.c.bf16 %v75_v2, %v71_v1  ;;  %v74_v7 = vld [vmem:[#allocation3 + $0x20] sm:$0xff]  ;;  %v2151_v8 = vpack.c.bf16 %v77_v5, %v73_v3  ;;  %v72_v10 = vld [vmem:[#allocation3 + $0x10] sm:$0xff]  ;;  %v79_v12 = vld [vmem:[#allocation3 + $0x48] sm:$0xff] }
  0x38   :  { %v2121_v9 = vpack.c.bf16 %v74_v7, %v70_v6  ;;  %v76_v11 = vld [vmem:[#allocation3 + $0x30] sm:$0xff]  ;;  %v83_v14 = vld [vmem:[#allocation3 + $0x68] sm:$0xff]  ;;  %v81_v15 = vld [vmem:[#allocation3 + $0x58] sm:$0xff] }
  0x39   :  { %2120 = vmatprep.subr.bf16.mxu0 %v2119_v4  ;;  %v2153_v13 = vpack.c.bf16 %v76_v11, %v72_v10  ;;  %v85_v16 = vld [vmem:[#allocation3 + $0x78] sm:$0xff]  ;;  %2152 = vmatprep.subr.bf16.mxu1 %v2151_v8  ;;  %v2123_v17 = vpack.c.bf16 %v83_v14, %v79_v12  ;;  %v78_v19 = vld [vmem:[#allocation3 + $0x40] sm:$0xff]  ;;  %v80_v21 = vld [vmem:[#allocation3 + $0x50] sm:$0xff] }
  0x3a   :  { %2122 = vmatpush1.bf16.msra.mxu0 %v2121_v9  ;;  %v2155_v18 = vpack.c.bf16 %v85_v16, %v81_v15  ;;  %v82_v20 = vld [vmem:[#allocation3 + $0x60] sm:$0xff]  ;;  %v84_v23 = vld [vmem:[#allocation3 + $0x70] sm:$0xff]  ;;  %v87_v24 = vld [vmem:[#allocation3 + $0x88] sm:$0xff] }
  0x3b   :  { %2154 = vmatpush1.bf16.msra.mxu1 %v2153_v13  ;;  %v2125_v22 = vpack.c.bf16 %v82_v20, %v78_v19  ;;  %v91_v25 = vld [vmem:[#allocation3 + $0xa8] sm:$0xff]  ;;  %2124 = vmatprep.subr.bf16.mxu0 %v2123_v17  ;;  %v2157_v26 = vpack.c.bf16 %v84_v23, %v80_v21  ;;  %v89_v28 = vld [vmem:[#allocation3 + $0x98] sm:$0xff]  ;;  %v86_v30 = vld [vmem:[#allocation3 + $0x80] sm:$0xff] }
  0x3c   :  { %2156 = vmatprep.subr.bf16.mxu1 %v2155_v18  ;;  %v2127_v27 = vpack.c.bf16 %v91_v25, %v87_v24  ;;  %v93_v29 = vld [vmem:[#allocation3 + $0xb8] sm:$0xff]  ;;  %v90_v32 = vld [vmem:[#allocation3 + $0xa0] sm:$0xff]  ;;  %v88_v33 = vld [vmem:[#allocation3 + $0x90] sm:$0xff] }
  0x3d   :  { %v2159_v31 = vpack.c.bf16 %v93_v29, %v89_v28  ;;  %v92_v34 = vld [vmem:[#allocation3 + $0xb0] sm:$0xff]  ;;  %v2129_v35 = vpack.c.bf16 %v90_v32, %v86_v30  ;;  %v95_v36 = vld [vmem:[#allocation3 + $0xc8] sm:$0xff]  ;;  %v97_v38 = vld [vmem:[#allocation3 + $0xd8] sm:$0xff] }
  0x3e   :  { %2126 = vmatpush1.bf16.msra.mxu0 %v2125_v22  ;;  %v99_v37 = vld [vmem:[#allocation3 + $0xe8] sm:$0xff]  ;;  %v2161_v39 = vpack.c.bf16 %v92_v34, %v88_v33  ;;  %v101_v41 = vld [vmem:[#allocation3 + $0xf8] sm:$0xff]  ;;  %v94_v42 = vld [vmem:[#allocation3 + $0xc0] sm:$0xff] }
  0x3f   :  { %2158 = vmatpush1.bf16.msra.mxu1 %v2157_v26  ;;  %2128 = vmatprep.subr.bf16.mxu0 %v2127_v27  ;;  %v2131_v40 = vpack.c.bf16 %v99_v37, %v95_v36  ;;  %v98_v43 = vld [vmem:[#allocation3 + $0xe0] sm:$0xff]  ;;  %v2163_v44 = vpack.c.bf16 %v101_v41, %v97_v38  ;;  %v96_v45 = vld [vmem:[#allocation3 + $0xd0] sm:$0xff]  ;;  %v103_v47 = vld [vmem:[#allocation3 + $0x108] sm:$0xff] }
  0x40   :  { %2160 = vmatprep.subr.bf16.mxu1 %v2159_v31  ;;  %v100_v46 = vld [vmem:[#allocation3 + $0xf0] sm:$0xff]  ;;  %v107_v48 = vld [vmem:[#allocation3 + $0x128] sm:$0xff]  ;;  %v105_v49 = vld [vmem:[#allocation3 + $0x118] sm:$0xff]  ;;  %v2133_v51 = vpack.c.bf16 %v98_v43, %v94_v42 }
  0x41   :  { %v109_v50 = vld [vmem:[#allocation3 + $0x138] sm:$0xff]  ;;  %v2165_v52 = vpack.c.bf16 %v100_v46, %v96_v45  ;;  %v2135_v53 = vpack.c.bf16 %v107_v48, %v103_v47  ;;  %v102_v54 = vld [vmem:[#allocation3 + $0x100] sm:$0xff]  ;;  %v104_v56 = vld [vmem:[#allocation3 + $0x110] sm:$0xff] }
  0x42   :  { %2130 = vmatpush1.bf16.msra.mxu0 %v2129_v35  ;;  %v106_v55 = vld [vmem:[#allocation3 + $0x120] sm:$0xff]  ;;  %v2167_v57 = vpack.c.bf16 %v109_v50, %v105_v49  ;;  %v108_v58 = vld [vmem:[#allocation3 + $0x130] sm:$0xff]  ;;  %v111_v59 = vld [vmem:[#allocation3 + $0x148] sm:$0xff] }
  0x43   :  { %2162 = vmatpush1.bf16.msra.mxu1 %v2161_v39  ;;  %2132 = vmatprep.subr.bf16.mxu0 %v2131_v40  ;;  %v115_v60 = vld [vmem:[#allocation3 + $0x168] sm:$0xff]  ;;  %v113_v61 = vld [vmem:[#allocation3 + $0x158] sm:$0xff]  ;;  %v2137_v63 = vpack.c.bf16 %v106_v55, %v102_v54  ;;  %v2169_v1 = vpack.c.bf16 %v108_v58, %v104_v56  ;;  %v110_v3 = vld [vmem:[#allocation3 + $0x140] sm:$0xff] }
  0x44   :  { %2164 = vmatprep.subr.bf16.mxu1 %v2163_v44  ;;  %v117_v62 = vld [vmem:[#allocation3 + $0x178] sm:$0xff]  ;;  %v2139_v2 = vpack.c.bf16 %v115_v60, %v111_v59  ;;  %v114_v4 = vld [vmem:[#allocation3 + $0x160] sm:$0xff]  ;;  %v112_v5 = vld [vmem:[#allocation3 + $0x150] sm:$0xff] }
  0x45   :  { %v2171_v6 = vpack.c.bf16 %v117_v62, %v113_v61  ;;  %v116_v7 = vld [vmem:[#allocation3 + $0x170] sm:$0xff]  ;;  %v119_v8 = vld [vmem:[#allocation3 + $0x188] sm:$0xff]  ;;  %v121_v10 = vld [vmem:[#allocation3 + $0x198] sm:$0xff]  ;;  %v2141_v12 = vpack.c.bf16 %v114_v4, %v110_v3 }
  0x46   :  { %2134 = vmatpush1.bf16.msra.mxu0 %v2133_v51  ;;  %v123_v9 = vld [vmem:[#allocation3 + $0x1a8] sm:$0xff]  ;;  %v125_v11 = vld [vmem:[#allocation3 + $0x1b8] sm:$0xff]  ;;  %v2173_v13 = vpack.c.bf16 %v116_v7, %v112_v5  ;;  %v118_v15 = vld [vmem:[#allocation3 + $0x180] sm:$0xff] }
  0x47   :  { %2166 = vmatpush1.bf16.msra.mxu1 %v2165_v52  ;;  %2136 = vmatprep.subr.bf16.mxu0 %v2135_v53  ;;  %v2143_v14 = vpack.c.bf16 %v123_v9, %v119_v8  ;;  %v122_v16 = vld [vmem:[#allocation3 + $0x1a0] sm:$0xff]  ;;  %v120_v17 = vld [vmem:[#allocation3 + $0x190] sm:$0xff]  ;;  %v2175_v18 = vpack.c.bf16 %v125_v11, %v121_v10  ;;  %v127_v20 = vld [vmem:[#allocation3 + $0x1c8] sm:$0xff] }
  0x48   :  { %2168 = vmatprep.subr.bf16.mxu1 %v2167_v57  ;;  %v124_v19 = vld [vmem:[#allocation3 + $0x1b0] sm:$0xff]  ;;  %v131_v21 = vld [vmem:[#allocation3 + $0x1e8] sm:$0xff]  ;;  %v129_v22 = vld [vmem:[#allocation3 + $0x1d8] sm:$0xff]  ;;  %v2145_v24 = vpack.c.bf16 %v122_v16, %v118_v15 }
  0x49   :  { %v133_v23 = vld [vmem:[#allocation3 + $0x1f8] sm:$0xff]  ;;  %v2177_v25 = vpack.c.bf16 %v124_v19, %v120_v17  ;;  %v2147_v26 = vpack.c.bf16 %v131_v21, %v127_v20  ;;  %v126_v27 = vld [vmem:[#allocation3 + $0x1c0] sm:$0xff]  ;;  %v128_v29 = vld [vmem:[#allocation3 + $0x1d0] sm:$0xff] }
  0x4a   :  { %2138 = vmatpush1.bf16.msra.mxu0 %v2137_v63  ;;  %v130_v28 = vld [vmem:[#allocation3 + $0x1e0] sm:$0xff]  ;;  %v2179_v30 = vpack.c.bf16 %v133_v23, %v129_v22  ;;  %v132_v31 = vld [vmem:[#allocation3 + $0x1f0] sm:$0xff]  ;;  %v419_v32 = vld [vmem:[#allocation5 + $0x8] sm:$0xff] }
  0x4b   :  { %2170 = vmatpush1.bf16.msra.mxu1 %v2169_v1  ;;  %2140 = vmatprep.subr.bf16.mxu0 %v2139_v2  ;;  %v423_v33 = vld [vmem:[#allocation5 + $0x28] sm:$0xff]  ;;  %v421_v34 = vld [vmem:[#allocation5 + $0x18] sm:$0xff]  ;;  %v2149_v36 = vpack.c.bf16 %v130_v28, %v126_v27  ;;  %v2181_v37 = vpack.c.bf16 %v132_v31, %v128_v29  ;;  %v418_v39 = vld [vmem:[#allocation5] sm:$0xff] }
  0x4c   :  { %2172 = vmatprep.subr.bf16.mxu1 %v2171_v6  ;;  %v425_v35 = vld [vmem:[#allocation5 + $0x38] sm:$0xff]  ;;  %v3093_v38 = vpack.c.bf16 %v423_v33, %v419_v32  ;;  %v422_v40 = vld [vmem:[#allocation5 + $0x20] sm:$0xff]  ;;  %v420_v42 = vld [vmem:[#allocation5 + $0x10] sm:$0xff] }
  0x4d   :  { %v3095_v41 = vpack.c.bf16 %v425_v35, %v421_v34  ;;  %v424_v43 = vld [vmem:[#allocation5 + $0x30] sm:$0xff]  ;;  %v427_v44 = vld [vmem:[#allocation5 + $0x48] sm:$0xff]  ;;  %v62_v46 = vld [vmem:[%s3592_s0] sm:$0xff]  ;;  %v3100_v47 = vpack.c.bf16 %v422_v40, %v418_v39 }
  0x4e   :  { %2142 = vmatpush1.bf16.msra.mxu0 %v2141_v12  ;;  %v431_v45 = vld [vmem:[#allocation5 + $0x68] sm:$0xff]  ;;  %v429_v48 = vld [vmem:[#allocation5 + $0x58] sm:$0xff]  ;;  %v3103_v50 = vpack.c.bf16 %v424_v43, %v420_v42  ;;  %v426_v51 = vld [vmem:[#allocation5 + $0x40] sm:$0xff] }
  0x4f   :  { %2174 = vmatpush1.bf16.msra.mxu1 %v2173_v13  ;;  %2144 = vmatprep.subr.bf16.mxu0 %v2143_v14  ;;  %v433_v49 = vld [vmem:[#allocation5 + $0x78] sm:$0xff]  ;;  %v430_v52 = vld [vmem:[#allocation5 + $0x60] sm:$0xff]  ;;  %v3106_v53 = vpack.c.bf16 %v431_v45, %v427_v44  ;;  %v428_v54 = vld [vmem:[#allocation5 + $0x50] sm:$0xff] }
  0x50   :  { %2176 = vmatprep.subr.bf16.mxu1 %v2175_v18  ;;  %v432_v55 = vld [vmem:[#allocation5 + $0x70] sm:$0xff]  ;;  %v3108_v56 = vpack.c.bf16 %v433_v49, %v429_v48  ;;  %v435_v57 = vld [vmem:[#allocation5 + $0x88] sm:$0xff]  ;;  %v3114_v60 = vpack.c.bf16 %v430_v52, %v426_v51  ;;  %v437_v61 = vld [vmem:[#allocation5 + $0x98] sm:$0xff] }
  0x51   :  { %v439_v58 = vld [vmem:[#allocation5 + $0xa8] sm:$0xff]  ;;  %v441_v62 = vld [vmem:[#allocation5 + $0xb8] sm:$0xff]  ;;  %v3118_v63 = vpack.c.bf16 %v432_v55, %v428_v54  ;;  %v434_v1 = vld [vmem:[#allocation5 + $0x80] sm:$0xff] }
  0x52   :  { %2146 = vmatpush1.bf16.msra.mxu0 %v2145_v24  ;;  %v63_v59 = vld [vmem:[%s3592_s0 + $0x8] sm:$0xff]  ;;  %v438_v2 = vld [vmem:[#allocation5 + $0xa0] sm:$0xff]  ;;  %v3122_v3 = vpack.c.bf16 %v439_v58, %v435_v57  ;;  %v436_v4 = vld [vmem:[#allocation5 + $0x90] sm:$0xff]  ;;  %v3125_v6 = vpack.c.bf16 %v441_v62, %v437_v61 }
  0x53   :  { %2178 = vmatpush1.bf16.msra.mxu1 %v2177_v25  ;;  %2148 = vmatprep.subr.bf16.mxu0 %v2147_v26  ;;  %v440_v5 = vld [vmem:[#allocation5 + $0xb0] sm:$0xff]  ;;  %v443_v7 = vld [vmem:[#allocation5 + $0xc8] sm:$0xff]  ;;  %v3131_v10 = vpack.c.bf16 %v438_v2, %v434_v1  ;;  %v445_v11 = vld [vmem:[#allocation5 + $0xd8] sm:$0xff] }
  0x54   :  { %2180 = vmatprep.subr.bf16.mxu1 %v2179_v30  ;;  %v447_v8 = vld [vmem:[#allocation5 + $0xe8] sm:$0xff]  ;;  %v64_v9 = vld [vmem:[%s3592_s0 + $0x10] sm:$0xff]  ;;  %v449_v12 = vld [vmem:[#allocation5 + $0xf8] sm:$0xff]  ;;  %v3135_v13 = vpack.c.bf16 %v440_v5, %v436_v4 }
  0x55   :  { %v442_v14 = vld [vmem:[#allocation5 + $0xc0] sm:$0xff]  ;;  %v3139_v16 = vpack.c.bf16 %v447_v8, %v443_v7  ;;  %v444_v17 = vld [vmem:[#allocation5 + $0xd0] sm:$0xff]  ;;  %v3142_v19 = vpack.c.bf16 %v449_v12, %v445_v11  ;;  %v451_v20 = vld [vmem:[#allocation5 + $0x108] sm:$0xff] }
  0x56   :  { %2150 = vmatpush1.bf16.msra.mxu0 %v2149_v36  ;;  %v446_v15 = vld [vmem:[#allocation5 + $0xe0] sm:$0xff]  ;;  %v448_v18 = vld [vmem:[#allocation5 + $0xf0] sm:$0xff]  ;;  %v455_v21 = vld [vmem:[#allocation5 + $0x128] sm:$0xff] }
  0x57   :  { %2182 = vmatpush1.bf16.msra.mxu1 %v2181_v37  ;;  %2184 = vmatprep.subr.bf16.mxu0 %v3093_v38  ;;  %v65_v22 = vld [vmem:[%s3592_s0 + $0x18] sm:$0xff]  ;;  %v3148_v23 = vpack.c.bf16 %v446_v15, %v442_v14  ;;  %v3152_v26 = vpack.c.bf16 %v448_v18, %v444_v17  ;;  %v450_v27 = vld [vmem:[#allocation5 + $0x100] sm:$0xff]  ;;  %v3156_v29 = vpack.c.bf16 %v455_v21, %v451_v20  ;;  %v452_v30 = vld [vmem:[#allocation5 + $0x110] sm:$0xff] }
  0x58   :  { %2216 = vmatprep.subr.bf16.mxu1 %v3095_v41  ;;  %v453_v24 = vld [vmem:[#allocation5 + $0x118] sm:$0xff]  ;;  %v454_v28 = vld [vmem:[#allocation5 + $0x120] sm:$0xff]  ;;  %v456_v31 = vld [vmem:[#allocation5 + $0x130] sm:$0xff] }
  0x59   :  { %221 = vmatmul.mubr.f32.vlgmr.msra.gmra.mrb[0].mxu0 %v62_v46  ;;  %v457_v25 = vld [vmem:[#allocation5 + $0x138] sm:$0xff]  ;;  %v459_v33 = vld [vmem:[#allocation5 + $0x148] sm:$0xff]  ;;  %v66_v35 = vld [vmem:[%s3592_s0 + $0x20] sm:$0xff]  ;;  %v3165_v36 = vpack.c.bf16 %v454_v28, %v450_v27  ;;  %v3169_v40 = vpack.c.bf16 %v456_v31, %v452_v30  ;;  %v136_v28 = vlaneseq }
  0x5a   :  { %334 = vmatmul.mubr.f32.vlgmr.msra.gmra.mrb[0].mxu1 %v62_v46  ;;  %2186 = vmatpush1.bf16.msra.mxu0 %v3100_v47  ;;  %v3159_v32 = vpack.c.bf16 %v457_v25, %v453_v24  ;;  %v463_v34 = vld [vmem:[#allocation5 + $0x168] sm:$0xff]  ;;  %v461_v37 = vld [vmem:[#allocation5 + $0x158] sm:$0xff]  ;;  %v458_v42 = vld [vmem:[#allocation5 + $0x140] sm:$0xff] }
  0x5b   :  { %2218 = vmatpush1.bf16.msra.mxu1 %v3103_v50  ;;  %226 = vmatprep.mubr.f32.mxu0 %v3010_v0  ;;  %v465_v39 = vld [vmem:[#allocation5 + $0x178] sm:$0xff]  ;;  %v462_v43 = vld [vmem:[#allocation5 + $0x160] sm:$0xff]  ;;  %v3173_v44 = vpack.c.bf16 %v463_v34, %v459_v33  ;;  %v460_v45 = vld [vmem:[#allocation5 + $0x150] sm:$0xff]  ;;  %v137_v30 = vshrl.u32 %v136_v28, 7 }
  0x5c   :  { %339 = vmatprep.mubr.f32.mxu1 %v3010_v0  ;;  %2188 = vmatprep.subr.bf16.mxu0 %v3106_v53  ;;  %v464_v46 = vld [vmem:[#allocation5 + $0x170] sm:$0xff]  ;;  %v3176_v48 = vpack.c.bf16 %v465_v39, %v461_v37  ;;  %v467_v49 = vld [vmem:[#allocation5 + $0x188] sm:$0xff]  ;;  %v3182_v54 = vpack.c.bf16 %v462_v43, %v458_v42  ;;  %v469_v55 = vld [vmem:[#allocation5 + $0x198] sm:$0xff] }
  0x5d   :  { %227 = vmatmul.mubr.f32.gmra.mrb[2].mxu0 %v63_v59  ;;  %2220 = vmatprep.subr.bf16.mxu1 %v3108_v56  ;;  %v471_v51 = vld [vmem:[#allocation5 + $0x1a8] sm:$0xff]  ;;  %v473_v57 = vld [vmem:[#allocation5 + $0x1b8] sm:$0xff]  ;;  %v3186_v58 = vpack.c.bf16 %v464_v46, %v460_v45  ;;  %v470_v61 = vld [vmem:[#allocation5 + $0x1a0] sm:$0xff]  ;;  %v138_v31 = vsub.s32 0, %v137_v30  ;;  %v142_v34 = vsub.s32 1, %v137_v30 }
  0x5e   :  { %340 = vmatmul.mubr.f32.gmra.mrb[2].mxu1 %v63_v59  ;;  %2190 = vmatpush1.bf16.msra.mxu0 %v3114_v60  ;;  %v67_v52 = vld [vmem:[%s3592_s0 + $0x28] sm:$0xff]  ;;  %v466_v59 = vld [vmem:[#allocation5 + $0x180] sm:$0xff]  ;;  %v3190_v62 = vpack.c.bf16 %v471_v51, %v467_v49  ;;  %v468_v1 = vld [vmem:[#allocation5 + $0x190] sm:$0xff]  ;;  %v3193_v4 = vpack.c.bf16 %v473_v57, %v469_v55 }
  0x5f   :  { %2222 = vmatpush1.bf16.msra.mxu1 %v3118_v63  ;;  %232 = vmatprep.mubr.f32.mxu0 %v3010_v0  ;;  %v472_v2 = vld [vmem:[#allocation5 + $0x1b0] sm:$0xff]  ;;  %v475_v5 = vld [vmem:[#allocation5 + $0x1c8] sm:$0xff]  ;;  %v477_v11 = vld [vmem:[#allocation5 + $0x1d8] sm:$0xff] }
  0x60   :  { %345 = vmatprep.mubr.f32.mxu1 %v3010_v0  ;;  %2192 = vmatprep.subr.bf16.mxu0 %v3122_v3  ;;  %v479_v7 = vld [vmem:[#allocation5 + $0x1e8] sm:$0xff]  ;;  %v68_v8 = vld [vmem:[%s3592_s0 + $0x30] sm:$0xff]  ;;  %v481_v12 = vld [vmem:[#allocation5 + $0x1f8] sm:$0xff]  ;;  %v3203_v14 = vpack.c.bf16 %v472_v2, %v468_v1  ;;  %v146_v1 = vsub.s32 2, %v137_v30 }
  0x61   :  { %233 = vmatmul.mubr.f32.gmra.mrb[4].mxu0 %v64_v9  ;;  %2224 = vmatprep.subr.bf16.mxu1 %v3125_v6  ;;  %v474_v15 = vld [vmem:[#allocation5 + $0x1c0] sm:$0xff]  ;;  %v3207_v18 = vpack.c.bf16 %v479_v7, %v475_v5  ;;  %v476_v20 = vld [vmem:[#allocation5 + $0x1d0] sm:$0xff]  ;;  %v69_v24 = vld [vmem:[%s3592_s0 + $0x38] sm:$0xff] }
  0x62   :  { %346 = vmatmul.mubr.f32.gmra.mrb[4].mxu1 %v64_v9  ;;  %2194 = vmatpush1.bf16.msra.mxu0 %v3131_v10  ;;  %v3199_v9 = vpack.c.bf16 %v470_v61, %v466_v59  ;;  %v478_v17 = vld [vmem:[#allocation5 + $0x1e0] sm:$0xff]  ;;  %v480_v21 = vld [vmem:[#allocation5 + $0x1f0] sm:$0xff] }
  0x63   :  { %2226 = vmatpush1.bf16.msra.mxu1 %v3135_v13  ;;  %238 = vmatprep.mubr.f32.mxu0 %v3010_v0  ;;  %v3216_v25 = vpack.c.bf16 %v478_v17, %v474_v15  ;;  %v3220_v27 = vpack.c.bf16 %v480_v21, %v476_v20  ;;  %v134_v33 = vld [vmem:[#allocation7] sm:$0xf] }
  0x64   :  { %351 = vmatprep.mubr.f32.mxu1 %v3010_v0  ;;  %2196 = vmatprep.subr.bf16.mxu0 %v3139_v16  ;;  %v3267_v37 = vrot.slane %v134_v33, %v138_v31  ;;  %v3269_v39 = vrot.slane %v134_v33, %v142_v34  ;;  %v3276_v2 = vrot.slane %v134_v33, %v146_v1 }
  0x65   :  { %239 = vmatmul.mubr.f32.gmra.mrb[6].mxu0 %v65_v22  ;;  %2228 = vmatprep.subr.bf16.mxu1 %v3142_v19 }
  0x66   :  { %352 = vmatmul.mubr.f32.gmra.mrb[6].mxu1 %v65_v22  ;;  %2198 = vmatpush1.bf16.msra.mxu0 %v3148_v23  ;;  %v3210_v22 = vpack.c.bf16 %v481_v12, %v477_v11 }
  0x67   :  { %2230 = vmatpush1.bf16.msra.mxu1 %v3152_v26  ;;  %244 = vmatprep.mubr.f32.mxu0 %v3010_v0 }
  0x68   :  { %357 = vmatprep.mubr.f32.mxu1 %v3010_v0  ;;  %2200 = vmatprep.subr.bf16.mxu0 %v3156_v29 }
  0x69   :  { %245 = vmatmul.mubr.f32.gmra.mrb[8].mxu0 %v66_v35  ;;  %2232 = vmatprep.subr.bf16.mxu1 %v3159_v32 }
  0x6a   :  { %358 = vmatmul.mubr.f32.gmra.mrb[8].mxu1 %v66_v35  ;;  %2202 = vmatpush1.bf16.msra.mxu0 %v3165_v36  ;;  %v150_v35 = vsub.s32 3, %v137_v30 }
  0x6b   :  { %2234 = vmatpush1.bf16.msra.mxu1 %v3169_v40  ;;  %250 = vmatprep.mubr.f32.mxu0 %v3010_v0 }
  0x6c   :  { %363 = vmatprep.mubr.f32.mxu1 %v3010_v0  ;;  %2204 = vmatprep.subr.bf16.mxu0 %v3173_v44  ;;  %v3271_v42 = vrot.slane %v134_v33, %v150_v35 }
  0x6d   :  { %251 = vmatmul.mubr.f32.gmra.mrb[10].mxu0 %v67_v52  ;;  %2236 = vmatprep.subr.bf16.mxu1 %v3176_v48 }
  0x6e   :  { %364 = vmatmul.mubr.f32.gmra.mrb[10].mxu1 %v67_v52  ;;  %2206 = vmatpush1.bf16.msra.mxu0 %v3182_v54 }
  0x6f   :  { %2238 = vmatpush1.bf16.msra.mxu1 %v3186_v58  ;;  %256 = vmatprep.mubr.f32.mxu0 %v3010_v0 }
  0x70   :  { %369 = vmatprep.mubr.f32.mxu1 %v3010_v0  ;;  %2208 = vmatprep.subr.bf16.mxu0 %v3190_v62 }
  0x71   :  { %257 = vmatmul.mubr.f32.gmra.mrb[12].mxu0 %v68_v8  ;;  %2240 = vmatprep.subr.bf16.mxu1 %v3193_v4 }
  0x72   :  { %370 = vmatmul.mubr.f32.gmra.mrb[12].mxu1 %v68_v8  ;;  %2210 = vmatpush1.bf16.msra.mxu0 %v3199_v9 }
  0x73   :  { %2242 = vmatpush1.bf16.msra.mxu1 %v3203_v14  ;;  %262 = vmatprep.mubr.f32.mxu0 %v3010_v0 }
  0x74   :  { %375 = vmatprep.mubr.f32.mxu1 %v3010_v0  ;;  %2212 = vmatprep.subr.bf16.mxu0 %v3207_v18 }
  0x75   :  { %263 = vmatmul.mubr.f32.gmra.mrb[14].mxu0 %v69_v24  ;;  %2244 = vmatprep.subr.bf16.mxu1 %v3210_v22 }
  0x76   :  { %376 = vmatmul.mubr.f32.gmra.mrb[14].mxu1 %v69_v24  ;;  %2214 = vmatpush1.bf16.msra.mxu0 %v3216_v25 }
  0x77   :  { %2246 = vmatpush1.bf16.msra.mxu1 %v3220_v27  ;;  %546 = vmatprep.mubr.f32.mxu0 %v3010_v0 }
  0x78   :  { %617 = vmatprep.mubr.f32.mxu1 %v3010_v0  ;;  %2248 = vmatprep.subr.bf16.mxu0 %v3093_v38 }
  0x79   :  { %547 = vmatmul.mubr.f32.vlgmr.msra.gmra.mrb[0].mxu0 %v3010_v0  ;;  %2280 = vmatprep.subr.bf16.mxu1 %v3095_v41 }
  0x7a   :  { %618 = vmatmul.mubr.f32.vlgmr.msra.gmra.mrb[0].mxu1 %v3010_v0  ;;  %2250 = vmatpush1.bf16.msra.mxu0 %v3100_v47 }
  0x7b   :  { %2282 = vmatpush1.bf16.msra.mxu1 %v3103_v50  ;;  %2252 = vmatprep.subr.bf16.mxu0 %v3106_v53 }
  0x7c   :  { %2284 = vmatprep.subr.bf16.mxu1 %v3108_v56  ;;  %727 = vmatprep.mubr.f32.mxu0 %v3010_v0 }
  0x7d   :  { %798 = vmatprep.mubr.f32.mxu1 %v3010_v0 }
  0x7e   :  { %2254 = vmatpush1.bf16.msra.mxu0 %v3114_v60 }
  0x7f   :  { %2286 = vmatpush1.bf16.msra.mxu1 %v3118_v63  ;;  %2256 = vmatprep.subr.bf16.mxu0 %v3122_v3 }
  0x80   :  { %2288 = vmatprep.subr.bf16.mxu1 %v3125_v6 }
  0x82   :  { %2258 = vmatpush1.bf16.msra.mxu0 %v3131_v10 }
  0x83   :  { %2290 = vmatpush1.bf16.msra.mxu1 %v3135_v13  ;;  %2260 = vmatprep.subr.bf16.mxu0 %v3139_v16 }
  0x84   :  { %2292 = vmatprep.subr.bf16.mxu1 %v3142_v19 }
  0x86   :  { %2262 = vmatpush1.bf16.msra.mxu0 %v3148_v23 }
  0x87   :  { %2294 = vmatpush1.bf16.msra.mxu1 %v3152_v26  ;;  %2264 = vmatprep.subr.bf16.mxu0 %v3156_v29 }
  0x88   :  { %2296 = vmatprep.subr.bf16.mxu1 %v3159_v32 }
  0x8a   :  { %2266 = vmatpush1.bf16.msra.mxu0 %v3165_v36 }
  0x8b   :  { %2298 = vmatpush1.bf16.msra.mxu1 %v3169_v40  ;;  %2268 = vmatprep.subr.bf16.mxu0 %v3173_v44 }
  0x8c   :  { %2300 = vmatprep.subr.bf16.mxu1 %v3176_v48 }
  0x8e   :  { %2270 = vmatpush1.bf16.msra.mxu0 %v3182_v54 }
  0x8f   :  { %2302 = vmatpush1.bf16.msra.mxu1 %v3186_v58  ;;  %2272 = vmatprep.subr.bf16.mxu0 %v3190_v62 }
  0x90   :  { %2304 = vmatprep.subr.bf16.mxu1 %v3193_v4 }
  0x92   :  { %2274 = vmatpush1.bf16.msra.mxu0 %v3199_v9 }
  0x93   :  { %2306 = vmatpush1.bf16.msra.mxu1 %v3203_v14  ;;  %2276 = vmatprep.subr.bf16.mxu0 %v3207_v18 }
  0x94   :  { %2308 = vmatprep.subr.bf16.mxu1 %v3210_v22 }
  0x96   :  { %2278 = vmatpush1.bf16.msra.mxu0 %v3216_v25 }
  0x97   :  { %2310 = vmatpush1.bf16.msra.mxu1 %v3220_v27  ;;  %2312 = vmatprep.subr.bf16.mxu0 %v3093_v38 }
  0x98   :  { %2344 = vmatprep.subr.bf16.mxu1 %v3095_v41 }
 0x14c   :  { %v548_v43 = vpop.f32.mrb[0].mxu0 }
 0x14d   :  { %v2719_v45 = vadd.f32 %v548_v43, %v3267_v37  ;;  %v619_v46 = vpop.f32.mrb[0].mxu1  ;;  %v550_v49 = vpop.f32.mrb[1].mxu0 }
 0x14e   :  { %v2720_v51 = vadd.f32 %v550_v49, %v3269_v39  ;;  %v621_v52 = vpop.f32.mrb[1].mxu1  ;;  %v2735_v5 = vadd.f32 %v619_v46, %v3276_v2 }
 0x14f   :  { %v2026_v55 = vmul.f32 -1.442695, %v2719_v45  ;;  %v2736_v57 = vadd.f32 %v621_v52, %v3271_v42 }
 0x150   :  { %v2027_v59 = vmul.f32 -1.442695, %v2720_v51  ;;  %v2028_v12 = vmul.f32 -1.442695, %v2735_v5 }
 0x151   :  { %v2029_v61 = vmul.f32 -1.442695, %v2736_v57  ;;  %2791 = vpow2.f32 %v2026_v55 }
 0x152   :  { %2793 = vpow2.f32 %v2027_v59 }
 0x153   :  { %2795 = vpow2.f32 %v2029_v61 }
 0x15b   :  { %v2792_v7 = vpop.eup %2791 }
 0x15c   :  { %v2794_v8 = vpop.eup %2793  ;;  %v640_v20 = vadd.f32 1.0, %v2792_v7 }
 0x15d   :  { %v2796_v11 = vpop.eup %2795  ;;  %v641_v15 = vadd.f32 1.0, %v2794_v8 }
 0x15e   :  { %v643_v17 = vadd.f32 1.0, %v2796_v11 }
 0x160   :  { %2797 = vrcp.f32 %v643_v17 }
 0x161   :  { %2799 = vpow2.f32 %v2028_v12 }
 0x162   :  { %2801 = vrcp.f32 %v641_v15 }
 0x163   :  { %2803 = vrcp.f32 %v640_v20 }
 0x16a   :  { %v2798_v21 = vpop.eup %2797 }
 0x16b   :  { %v2800_v24 = vpop.eup %2799  ;;  %v652_v28 = vmul.f32 2.0, %v2798_v21 }
 0x16c   :  { %v2802_v30 = vpop.eup %2801  ;;  %v642_v34 = vadd.f32 1.0, %v2800_v24 }
 0x16d   :  { %v2030_v31 = vadd.f32 -1.0, %v652_v28  ;;  %v2804_v33 = vpop.eup %2803  ;;  %v654_v35 = vmul.f32 0.0, %v2802_v30 }
 0x16e   :  { %2805 = vrcp.f32 %v642_v34 }
 0x16f   :  { %v655_v43 = vmul.f32 %v2804_v33, %v2030_v31 }
 0x171   :  { %v3279_v45 = vadd.f32 %v655_v43, %v654_v35 }
 0x173   :  { %2807 = vtanh.f32 %v3279_v45 }
 0x178   :  { %v2806_v46 = vpop.eup %2805 }
 0x17d   :  { %v2808_v49 = vpop.eup %2807 }
 0x17e   :  { %v658_v51 = vmul.f32 %v2808_v49, %v2806_v46 }
 0x180   :  { %728 = vmatmul.mubr.f32.vlgmr.msra.gmra.mrb[2].mxu0 %v658_v51  ;;  %799 = vmatmul.mubr.f32.vlgmr.msra.gmra.mrb[2].mxu1 %v658_v51 }
 0x181   :  { %2314 = vmatpush1.bf16.msra.mxu0 %v3100_v47  ;;  %2346 = vmatpush1.bf16.msra.mxu1 %v3103_v50 }
 0x182   :  { %2316 = vmatprep.subr.bf16.mxu0 %v3106_v53  ;;  %2348 = vmatprep.subr.bf16.mxu1 %v3108_v56 }
 0x183   :  { %908 = vmatprep.mubr.f32.mxu0 %v3010_v0  ;;  %979 = vmatprep.mubr.f32.mxu1 %v3010_v0 }
 0x185   :  { %2318 = vmatpush1.bf16.msra.mxu0 %v3114_v60  ;;  %2350 = vmatpush1.bf16.msra.mxu1 %v3118_v63 }
 0x186   :  { %2320 = vmatprep.subr.bf16.mxu0 %v3122_v3  ;;  %2352 = vmatprep.subr.bf16.mxu1 %v3125_v6 }
 0x189   :  { %2322 = vmatpush1.bf16.msra.mxu0 %v3131_v10  ;;  %2354 = vmatpush1.bf16.msra.mxu1 %v3135_v13 }
 0x18a   :  { %2324 = vmatprep.subr.bf16.mxu0 %v3139_v16  ;;  %2356 = vmatprep.subr.bf16.mxu1 %v3142_v19 }
 0x18d   :  { %2326 = vmatpush1.bf16.msra.mxu0 %v3148_v23  ;;  %2358 = vmatpush1.bf16.msra.mxu1 %v3152_v26 }
 0x18e   :  { %2328 = vmatprep.subr.bf16.mxu0 %v3156_v29  ;;  %2360 = vmatprep.subr.bf16.mxu1 %v3159_v32 }
 0x191   :  { %2330 = vmatpush1.bf16.msra.mxu0 %v3165_v36  ;;  %2362 = vmatpush1.bf16.msra.mxu1 %v3169_v40 }
 0x192   :  { %2332 = vmatprep.subr.bf16.mxu0 %v3173_v44  ;;  %2364 = vmatprep.subr.bf16.mxu1 %v3176_v48 }
 0x195   :  { %2334 = vmatpush1.bf16.msra.mxu0 %v3182_v54  ;;  %2366 = vmatpush1.bf16.msra.mxu1 %v3186_v58 }
 0x196   :  { %2336 = vmatprep.subr.bf16.mxu0 %v3190_v62  ;;  %2368 = vmatprep.subr.bf16.mxu1 %v3193_v4 }
 0x199   :  { %2338 = vmatpush1.bf16.msra.mxu0 %v3199_v9  ;;  %2370 = vmatpush1.bf16.msra.mxu1 %v3203_v14 }
 0x19a   :  { %2340 = vmatprep.subr.bf16.mxu0 %v3207_v18  ;;  %2372 = vmatprep.subr.bf16.mxu1 %v3210_v22 }
 0x19d   :  { %2342 = vmatpush1.bf16.msra.mxu0 %v3216_v25  ;;  %2374 = vmatpush1.bf16.msra.mxu1 %v3220_v27 }
 0x19e   :  { %2376 = vmatprep.subr.bf16.mxu0 %v3093_v38  ;;  %2408 = vmatprep.subr.bf16.mxu1 %v3095_v41 }
 0x253   :  { %v729_v52 = vpop.f32.mrb[2].mxu0  ;;  %v800_v55 = vpop.f32.mrb[2].mxu1 }
 0x254   :  { %v2721_v57 = vadd.f32 %v729_v52, %v3267_v37  ;;  %v731_v59 = vpop.f32.mrb[3].mxu0  ;;  %v802_v61 = vpop.f32.mrb[3].mxu1  ;;  %v2737_v12 = vadd.f32 %v800_v55, %v3276_v2 }
 0x255   :  { %v2722_v1 = vadd.f32 %v731_v59, %v3269_v39  ;;  %v2738_v5 = vadd.f32 %v802_v61, %v3271_v42 }
 0x256   :  { %v2031_v7 = vmul.f32 -1.442695, %v2721_v57  ;;  %v2033_v21 = vmul.f32 -1.442695, %v2737_v12 }
 0x257   :  { %v2032_v8 = vmul.f32 -1.442695, %v2722_v1  ;;  %v2034_v11 = vmul.f32 -1.442695, %v2738_v5 }
 0x258   :  { %2809 = vpow2.f32 %v2031_v7 }
 0x259   :  { %2811 = vpow2.f32 %v2032_v8 }
 0x25a   :  { %2813 = vpow2.f32 %v2034_v11 }
 0x262   :  { %v2810_v15 = vpop.eup %2809 }
 0x263   :  { %v2812_v17 = vpop.eup %2811  ;;  %v821_v30 = vadd.f32 1.0, %v2810_v15 }
 0x264   :  { %v2814_v20 = vpop.eup %2813  ;;  %v822_v24 = vadd.f32 1.0, %v2812_v17 }
 0x265   :  { %v824_v28 = vadd.f32 1.0, %v2814_v20 }
 0x267   :  { %2815 = vrcp.f32 %v824_v28 }
 0x268   :  { %2817 = vpow2.f32 %v2033_v21 }
 0x269   :  { %2819 = vrcp.f32 %v822_v24 }
 0x26a   :  { %2821 = vrcp.f32 %v821_v30 }
 0x271   :  { %v2816_v31 = vpop.eup %2815 }
 0x272   :  { %v2818_v33 = vpop.eup %2817  ;;  %v833_v34 = vmul.f32 2.0, %v2816_v31 }
 0x273   :  { %v2820_v35 = vpop.eup %2819  ;;  %v823_v49 = vadd.f32 1.0, %v2818_v33 }
 0x274   :  { %v2035_v43 = vadd.f32 -1.0, %v833_v34  ;;  %v2822_v46 = vpop.eup %2821  ;;  %v835_v51 = vmul.f32 %v2820_v35, %v3279_v45 }
 0x275   :  { %2823 = vrcp.f32 %v823_v49 }
 0x276   :  { %v836_v52 = vmul.f32 %v2822_v46, %v2035_v43 }
 0x278   :  { %v3321_v55 = vadd.f32 %v836_v52, %v835_v51 }
 0x27a   :  { %2825 = vtanh.f32 %v3321_v55 }
 0x27f   :  { %v2824_v57 = vpop.eup %2823 }
 0x284   :  { %v2826_v59 = vpop.eup %2825 }
 0x285   :  { %v839_v61 = vmul.f32 %v2826_v59, %v2824_v57 }
 0x287   :  { %909 = vmatmul.mubr.f32.vlgmr.msra.gmra.mrb[4].mxu0 %v839_v61  ;;  %980 = vmatmul.mubr.f32.vlgmr.msra.gmra.mrb[4].mxu1 %v839_v61 }
 0x288   :  { %2378 = vmatpush1.bf16.msra.mxu0 %v3100_v47  ;;  %2410 = vmatpush1.bf16.msra.mxu1 %v3103_v50 }
 0x289   :  { %2380 = vmatprep.subr.bf16.mxu0 %v3106_v53  ;;  %2412 = vmatprep.subr.bf16.mxu1 %v3108_v56 }
 0x28a   :  { %1089 = vmatprep.mubr.f32.mxu0 %v3010_v0  ;;  %1160 = vmatprep.mubr.f32.mxu1 %v3010_v0 }
 0x28c   :  { %2382 = vmatpush1.bf16.msra.mxu0 %v3114_v60  ;;  %2414 = vmatpush1.bf16.msra.mxu1 %v3118_v63 }
 0x28d   :  { %2384 = vmatprep.subr.bf16.mxu0 %v3122_v3  ;;  %2416 = vmatprep.subr.bf16.mxu1 %v3125_v6 }
 0x290   :  { %2386 = vmatpush1.bf16.msra.mxu0 %v3131_v10  ;;  %2418 = vmatpush1.bf16.msra.mxu1 %v3135_v13 }
 0x291   :  { %2388 = vmatprep.subr.bf16.mxu0 %v3139_v16  ;;  %2420 = vmatprep.subr.bf16.mxu1 %v3142_v19 }
 0x294   :  { %2390 = vmatpush1.bf16.msra.mxu0 %v3148_v23  ;;  %2422 = vmatpush1.bf16.msra.mxu1 %v3152_v26 }
 0x295   :  { %2392 = vmatprep.subr.bf16.mxu0 %v3156_v29  ;;  %2424 = vmatprep.subr.bf16.mxu1 %v3159_v32 }
 0x298   :  { %2394 = vmatpush1.bf16.msra.mxu0 %v3165_v36  ;;  %2426 = vmatpush1.bf16.msra.mxu1 %v3169_v40 }
 0x299   :  { %2396 = vmatprep.subr.bf16.mxu0 %v3173_v44  ;;  %2428 = vmatprep.subr.bf16.mxu1 %v3176_v48 }
 0x29c   :  { %2398 = vmatpush1.bf16.msra.mxu0 %v3182_v54  ;;  %2430 = vmatpush1.bf16.msra.mxu1 %v3186_v58 }
 0x29d   :  { %2400 = vmatprep.subr.bf16.mxu0 %v3190_v62  ;;  %2432 = vmatprep.subr.bf16.mxu1 %v3193_v4 }
 0x2a0   :  { %2402 = vmatpush1.bf16.msra.mxu0 %v3199_v9  ;;  %2434 = vmatpush1.bf16.msra.mxu1 %v3203_v14 }
 0x2a1   :  { %2404 = vmatprep.subr.bf16.mxu0 %v3207_v18  ;;  %2436 = vmatprep.subr.bf16.mxu1 %v3210_v22 }
 0x2a4   :  { %2406 = vmatpush1.bf16.msra.mxu0 %v3216_v25  ;;  %2438 = vmatpush1.bf16.msra.mxu1 %v3220_v27 }
 0x2a5   :  { %2440 = vmatprep.subr.bf16.mxu0 %v3093_v38  ;;  %2472 = vmatprep.subr.bf16.mxu1 %v3095_v41 }
 0x35a   :  { %v910_v45 = vpop.f32.mrb[4].mxu0  ;;  %v981_v1 = vpop.f32.mrb[4].mxu1 }
 0x35b   :  { %v2723_v5 = vadd.f32 %v910_v45, %v3267_v37  ;;  %v912_v7 = vpop.f32.mrb[5].mxu0  ;;  %v983_v8 = vpop.f32.mrb[5].mxu1  ;;  %v2739_v21 = vadd.f32 %v981_v1, %v3276_v2 }
 0x35c   :  { %v2724_v11 = vadd.f32 %v912_v7, %v3269_v39  ;;  %v2740_v12 = vadd.f32 %v983_v8, %v3271_v42 }
 0x35d   :  { %v2036_v15 = vmul.f32 -1.442695, %v2723_v5  ;;  %v2038_v31 = vmul.f32 -1.442695, %v2739_v21 }
 0x35e   :  { %v2037_v17 = vmul.f32 -1.442695, %v2724_v11  ;;  %v2039_v20 = vmul.f32 -1.442695, %v2740_v12 }
 0x35f   :  { %2827 = vpow2.f32 %v2036_v15 }
 0x360   :  { %2829 = vpow2.f32 %v2037_v17 }
 0x361   :  { %2831 = vpow2.f32 %v2039_v20 }
 0x369   :  { %v2828_v24 = vpop.eup %2827 }
 0x36a   :  { %v2830_v28 = vpop.eup %2829  ;;  %v1002_v35 = vadd.f32 1.0, %v2828_v24 }
 0x36b   :  { %v2832_v30 = vpop.eup %2831  ;;  %v1003_v33 = vadd.f32 1.0, %v2830_v28 }
 0x36c   :  { %v1005_v34 = vadd.f32 1.0, %v2832_v30 }
 0x36e   :  { %2833 = vrcp.f32 %v1005_v34 }
 0x36f   :  { %2835 = vpow2.f32 %v2038_v31 }
 0x370   :  { %2837 = vrcp.f32 %v1003_v33 }
 0x371   :  { %2839 = vrcp.f32 %v1002_v35 }
 0x378   :  { %v2834_v43 = vpop.eup %2833 }
 0x379   :  { %v2836_v46 = vpop.eup %2835  ;;  %v1014_v49 = vmul.f32 2.0, %v2834_v43 }
 0x37a   :  { %v2838_v51 = vpop.eup %2837  ;;  %v1004_v59 = vadd.f32 1.0, %v2836_v46 }
 0x37b   :  { %v2040_v52 = vadd.f32 -1.0, %v1014_v49  ;;  %v2840_v57 = vpop.eup %2839  ;;  %v1016_v61 = vmul.f32 %v2838_v51, %v3321_v55 }
 0x37c   :  { %2841 = vrcp.f32 %v1004_v59 }
 0x37d   :  { %v1017_v45 = vmul.f32 %v2840_v57, %v2040_v52 }
 0x37f   :  { %v3363_v1 = vadd.f32 %v1017_v45, %v1016_v61 }
 0x381   :  { %2843 = vtanh.f32 %v3363_v1 }
 0x386   :  { %v2842_v5 = vpop.eup %2841 }
 0x38b   :  { %v2844_v7 = vpop.eup %2843 }
 0x38c   :  { %v1020_v8 = vmul.f32 %v2844_v7, %v2842_v5 }
 0x38e   :  { %1090 = vmatmul.mubr.f32.vlgmr.msra.gmra.mrb[6].mxu0 %v1020_v8  ;;  %1161 = vmatmul.mubr.f32.vlgmr.msra.gmra.mrb[6].mxu1 %v1020_v8 }
 0x38f   :  { %2442 = vmatpush1.bf16.msra.mxu0 %v3100_v47  ;;  %2474 = vmatpush1.bf16.msra.mxu1 %v3103_v50 }
 0x390   :  { %2444 = vmatprep.subr.bf16.mxu0 %v3106_v53  ;;  %2476 = vmatprep.subr.bf16.mxu1 %v3108_v56 }
 0x391   :  { %1270 = vmatprep.mubr.f32.mxu0 %v3010_v0  ;;  %1341 = vmatprep.mubr.f32.mxu1 %v3010_v0 }
 0x393   :  { %2446 = vmatpush1.bf16.msra.mxu0 %v3114_v60  ;;  %2478 = vmatpush1.bf16.msra.mxu1 %v3118_v63 }
 0x394   :  { %2448 = vmatprep.subr.bf16.mxu0 %v3122_v3  ;;  %2480 = vmatprep.subr.bf16.mxu1 %v3125_v6 }
 0x397   :  { %2450 = vmatpush1.bf16.msra.mxu0 %v3131_v10  ;;  %2482 = vmatpush1.bf16.msra.mxu1 %v3135_v13 }
 0x398   :  { %2452 = vmatprep.subr.bf16.mxu0 %v3139_v16  ;;  %2484 = vmatprep.subr.bf16.mxu1 %v3142_v19 }
 0x39b   :  { %2454 = vmatpush1.bf16.msra.mxu0 %v3148_v23  ;;  %2486 = vmatpush1.bf16.msra.mxu1 %v3152_v26 }
 0x39c   :  { %2456 = vmatprep.subr.bf16.mxu0 %v3156_v29  ;;  %2488 = vmatprep.subr.bf16.mxu1 %v3159_v32 }
 0x39f   :  { %2458 = vmatpush1.bf16.msra.mxu0 %v3165_v36  ;;  %2490 = vmatpush1.bf16.msra.mxu1 %v3169_v40 }
 0x3a0   :  { %2460 = vmatprep.subr.bf16.mxu0 %v3173_v44  ;;  %2492 = vmatprep.subr.bf16.mxu1 %v3176_v48 }
 0x3a3   :  { %2462 = vmatpush1.bf16.msra.mxu0 %v3182_v54  ;;  %2494 = vmatpush1.bf16.msra.mxu1 %v3186_v58 }
 0x3a4   :  { %2464 = vmatprep.subr.bf16.mxu0 %v3190_v62  ;;  %2496 = vmatprep.subr.bf16.mxu1 %v3193_v4 }
 0x3a7   :  { %2466 = vmatpush1.bf16.msra.mxu0 %v3199_v9  ;;  %2498 = vmatpush1.bf16.msra.mxu1 %v3203_v14 }
 0x3a8   :  { %2468 = vmatprep.subr.bf16.mxu0 %v3207_v18  ;;  %2500 = vmatprep.subr.bf16.mxu1 %v3210_v22 }
 0x3ab   :  { %2470 = vmatpush1.bf16.msra.mxu0 %v3216_v25  ;;  %2502 = vmatpush1.bf16.msra.mxu1 %v3220_v27 }
 0x3ac   :  { %2504 = vmatprep.subr.bf16.mxu0 %v3093_v38  ;;  %2536 = vmatprep.subr.bf16.mxu1 %v3095_v41 }
 0x461   :  { %v1091_v55 = vpop.f32.mrb[6].mxu0  ;;  %v1162_v11 = vpop.f32.mrb[6].mxu1 }
 0x462   :  { %v2725_v12 = vadd.f32 %v1091_v55, %v3267_v37  ;;  %v1093_v15 = vpop.f32.mrb[7].mxu0  ;;  %v1164_v17 = vpop.f32.mrb[7].mxu1  ;;  %v2741_v31 = vadd.f32 %v1162_v11, %v3276_v2 }
 0x463   :  { %v2726_v20 = vadd.f32 %v1093_v15, %v3269_v39  ;;  %v2742_v21 = vadd.f32 %v1164_v17, %v3271_v42 }
 0x464   :  { %v2041_v24 = vmul.f32 -1.442695, %v2725_v12  ;;  %v2043_v43 = vmul.f32 -1.442695, %v2741_v31 }
 0x465   :  { %v2042_v28 = vmul.f32 -1.442695, %v2726_v20  ;;  %v2044_v30 = vmul.f32 -1.442695, %v2742_v21 }
 0x466   :  { %2845 = vpow2.f32 %v2041_v24 }
 0x467   :  { %2847 = vpow2.f32 %v2042_v28 }
 0x468   :  { %2849 = vpow2.f32 %v2044_v30 }
 0x470   :  { %v2846_v33 = vpop.eup %2845 }
 0x471   :  { %v2848_v34 = vpop.eup %2847  ;;  %v1183_v51 = vadd.f32 1.0, %v2846_v33 }
 0x472   :  { %v2850_v35 = vpop.eup %2849  ;;  %v1184_v46 = vadd.f32 1.0, %v2848_v34 }
 0x473   :  { %v1186_v49 = vadd.f32 1.0, %v2850_v35 }
 0x475   :  { %2851 = vrcp.f32 %v1186_v49 }
 0x476   :  { %2853 = vpow2.f32 %v2043_v43 }
 0x477   :  { %2855 = vrcp.f32 %v1184_v46 }
 0x478   :  { %2857 = vrcp.f32 %v1183_v51 }
 0x47f   :  { %v2852_v52 = vpop.eup %2851 }
 0x480   :  { %v2854_v57 = vpop.eup %2853  ;;  %v1195_v59 = vmul.f32 2.0, %v2852_v52 }
 0x481   :  { %v2856_v61 = vpop.eup %2855  ;;  %v1185_v7 = vadd.f32 1.0, %v2854_v57 }
 0x482   :  { %v2045_v45 = vadd.f32 -1.0, %v1195_v59  ;;  %v2858_v5 = vpop.eup %2857  ;;  %v1197_v8 = vmul.f32 %v2856_v61, %v3363_v1 }
 0x483   :  { %2859 = vrcp.f32 %v1185_v7 }
 0x484   :  { %v1198_v55 = vmul.f32 %v2858_v5, %v2045_v45 }
 0x486   :  { %v3405_v11 = vadd.f32 %v1198_v55, %v1197_v8 }
 0x488   :  { %2861 = vtanh.f32 %v3405_v11 }
 0x48d   :  { %v2860_v12 = vpop.eup %2859 }
 0x492   :  { %v2862_v15 = vpop.eup %2861 }
 0x493   :  { %v1201_v17 = vmul.f32 %v2862_v15, %v2860_v12 }
 0x495   :  { %1271 = vmatmul.mubr.f32.vlgmr.msra.gmra.mrb[8].mxu0 %v1201_v17  ;;  %1342 = vmatmul.mubr.f32.vlgmr.msra.gmra.mrb[8].mxu1 %v1201_v17 }
 0x496   :  { %2506 = vmatpush1.bf16.msra.mxu0 %v3100_v47  ;;  %2538 = vmatpush1.bf16.msra.mxu1 %v3103_v50 }
 0x497   :  { %2508 = vmatprep.subr.bf16.mxu0 %v3106_v53  ;;  %2540 = vmatprep.subr.bf16.mxu1 %v3108_v56 }
 0x498   :  { %1451 = vmatprep.mubr.f32.mxu0 %v3010_v0  ;;  %1522 = vmatprep.mubr.f32.mxu1 %v3010_v0 }
 0x49a   :  { %2510 = vmatpush1.bf16.msra.mxu0 %v3114_v60  ;;  %2542 = vmatpush1.bf16.msra.mxu1 %v3118_v63 }
 0x49b   :  { %2512 = vmatprep.subr.bf16.mxu0 %v3122_v3  ;;  %2544 = vmatprep.subr.bf16.mxu1 %v3125_v6 }
 0x49e   :  { %2514 = vmatpush1.bf16.msra.mxu0 %v3131_v10  ;;  %2546 = vmatpush1.bf16.msra.mxu1 %v3135_v13 }
 0x49f   :  { %2516 = vmatprep.subr.bf16.mxu0 %v3139_v16  ;;  %2548 = vmatprep.subr.bf16.mxu1 %v3142_v19 }
 0x4a2   :  { %2518 = vmatpush1.bf16.msra.mxu0 %v3148_v23  ;;  %2550 = vmatpush1.bf16.msra.mxu1 %v3152_v26 }
 0x4a3   :  { %2520 = vmatprep.subr.bf16.mxu0 %v3156_v29  ;;  %2552 = vmatprep.subr.bf16.mxu1 %v3159_v32 }
 0x4a6   :  { %2522 = vmatpush1.bf16.msra.mxu0 %v3165_v36  ;;  %2554 = vmatpush1.bf16.msra.mxu1 %v3169_v40 }
 0x4a7   :  { %2524 = vmatprep.subr.bf16.mxu0 %v3173_v44  ;;  %2556 = vmatprep.subr.bf16.mxu1 %v3176_v48 }
 0x4aa   :  { %2526 = vmatpush1.bf16.msra.mxu0 %v3182_v54  ;;  %2558 = vmatpush1.bf16.msra.mxu1 %v3186_v58 }
 0x4ab   :  { %2528 = vmatprep.subr.bf16.mxu0 %v3190_v62  ;;  %2560 = vmatprep.subr.bf16.mxu1 %v3193_v4 }
 0x4ae   :  { %2530 = vmatpush1.bf16.msra.mxu0 %v3199_v9  ;;  %2562 = vmatpush1.bf16.msra.mxu1 %v3203_v14 }
 0x4af   :  { %2532 = vmatprep.subr.bf16.mxu0 %v3207_v18  ;;  %2564 = vmatprep.subr.bf16.mxu1 %v3210_v22 }
 0x4b2   :  { %2534 = vmatpush1.bf16.msra.mxu0 %v3216_v25  ;;  %2566 = vmatpush1.bf16.msra.mxu1 %v3220_v27 }
 0x4b3   :  { %2568 = vmatprep.subr.bf16.mxu0 %v3093_v38  ;;  %2600 = vmatprep.subr.bf16.mxu1 %v3095_v41 }
 0x568   :  { %v1272_v1 = vpop.f32.mrb[8].mxu0  ;;  %v1343_v20 = vpop.f32.mrb[8].mxu1 }
 0x569   :  { %v2727_v21 = vadd.f32 %v1272_v1, %v3267_v37  ;;  %v1274_v24 = vpop.f32.mrb[9].mxu0  ;;  %v1345_v28 = vpop.f32.mrb[9].mxu1  ;;  %v2743_v43 = vadd.f32 %v1343_v20, %v3276_v2 }
 0x56a   :  { %v2728_v30 = vadd.f32 %v1274_v24, %v3269_v39  ;;  %v2744_v31 = vadd.f32 %v1345_v28, %v3271_v42 }
 0x56b   :  { %v2046_v33 = vmul.f32 -1.442695, %v2727_v21  ;;  %v2048_v52 = vmul.f32 -1.442695, %v2743_v43 }
 0x56c   :  { %v2047_v34 = vmul.f32 -1.442695, %v2728_v30  ;;  %v2049_v35 = vmul.f32 -1.442695, %v2744_v31 }
 0x56d   :  { %2863 = vpow2.f32 %v2046_v33 }
 0x56e   :  { %2865 = vpow2.f32 %v2047_v34 }
 0x56f   :  { %2867 = vpow2.f32 %v2049_v35 }
 0x577   :  { %v2864_v46 = vpop.eup %2863 }
 0x578   :  { %v2866_v49 = vpop.eup %2865  ;;  %v1364_v61 = vadd.f32 1.0, %v2864_v46 }
 0x579   :  { %v2868_v51 = vpop.eup %2867  ;;  %v1365_v57 = vadd.f32 1.0, %v2866_v49 }
 0x57a   :  { %v1367_v59 = vadd.f32 1.0, %v2868_v51 }
 0x57c   :  { %2869 = vrcp.f32 %v1367_v59 }
 0x57d   :  { %2871 = vpow2.f32 %v2048_v52 }
 0x57e   :  { %2873 = vrcp.f32 %v1365_v57 }
 0x57f   :  { %2875 = vrcp.f32 %v1364_v61 }
 0x586   :  { %v2870_v45 = vpop.eup %2869 }
 0x587   :  { %v2872_v5 = vpop.eup %2871  ;;  %v1376_v7 = vmul.f32 2.0, %v2870_v45 }
 0x588   :  { %v2874_v8 = vpop.eup %2873  ;;  %v1366_v15 = vadd.f32 1.0, %v2872_v5 }
 0x589   :  { %v2050_v55 = vadd.f32 -1.0, %v1376_v7  ;;  %v2876_v12 = vpop.eup %2875  ;;  %v1378_v17 = vmul.f32 %v2874_v8, %v3405_v11 }
 0x58a   :  { %2877 = vrcp.f32 %v1366_v15 }
 0x58b   :  { %v1379_v1 = vmul.f32 %v2876_v12, %v2050_v55 }
 0x58d   :  { %v3447_v20 = vadd.f32 %v1379_v1, %v1378_v17 }
 0x58f   :  { %2879 = vtanh.f32 %v3447_v20 }
 0x594   :  { %v2878_v21 = vpop.eup %2877 }
 0x599   :  { %v2880_v24 = vpop.eup %2879 }
 0x59a   :  { %v1382_v28 = vmul.f32 %v2880_v24, %v2878_v21 }
 0x59c   :  { %1452 = vmatmul.mubr.f32.vlgmr.msra.gmra.mrb[10].mxu0 %v1382_v28  ;;  %1523 = vmatmul.mubr.f32.vlgmr.msra.gmra.mrb[10].mxu1 %v1382_v28 }
 0x59d   :  { %2570 = vmatpush1.bf16.msra.mxu0 %v3100_v47  ;;  %2602 = vmatpush1.bf16.msra.mxu1 %v3103_v50 }
 0x59e   :  { %2572 = vmatprep.subr.bf16.mxu0 %v3106_v53  ;;  %2604 = vmatprep.subr.bf16.mxu1 %v3108_v56 }
 0x59f   :  { %1632 = vmatprep.mubr.f32.mxu0 %v3010_v0  ;;  %1703 = vmatprep.mubr.f32.mxu1 %v3010_v0 }
 0x5a1   :  { %2574 = vmatpush1.bf16.msra.mxu0 %v3114_v60  ;;  %2606 = vmatpush1.bf16.msra.mxu1 %v3118_v63 }
 0x5a2   :  { %2576 = vmatprep.subr.bf16.mxu0 %v3122_v3  ;;  %2608 = vmatprep.subr.bf16.mxu1 %v3125_v6 }
 0x5a5   :  { %2578 = vmatpush1.bf16.msra.mxu0 %v3131_v10  ;;  %2610 = vmatpush1.bf16.msra.mxu1 %v3135_v13 }
 0x5a6   :  { %2580 = vmatprep.subr.bf16.mxu0 %v3139_v16  ;;  %2612 = vmatprep.subr.bf16.mxu1 %v3142_v19 }
 0x5a9   :  { %2582 = vmatpush1.bf16.msra.mxu0 %v3148_v23  ;;  %2614 = vmatpush1.bf16.msra.mxu1 %v3152_v26 }
 0x5aa   :  { %2584 = vmatprep.subr.bf16.mxu0 %v3156_v29  ;;  %2616 = vmatprep.subr.bf16.mxu1 %v3159_v32 }
 0x5ad   :  { %2586 = vmatpush1.bf16.msra.mxu0 %v3165_v36  ;;  %2618 = vmatpush1.bf16.msra.mxu1 %v3169_v40 }
 0x5ae   :  { %2588 = vmatprep.subr.bf16.mxu0 %v3173_v44  ;;  %2620 = vmatprep.subr.bf16.mxu1 %v3176_v48 }
 0x5b1   :  { %2590 = vmatpush1.bf16.msra.mxu0 %v3182_v54  ;;  %2622 = vmatpush1.bf16.msra.mxu1 %v3186_v58 }
 0x5b2   :  { %2592 = vmatprep.subr.bf16.mxu0 %v3190_v62  ;;  %2624 = vmatprep.subr.bf16.mxu1 %v3193_v4 }
 0x5b5   :  { %2594 = vmatpush1.bf16.msra.mxu0 %v3199_v9  ;;  %2626 = vmatpush1.bf16.msra.mxu1 %v3203_v14 }
 0x5b6   :  { %2596 = vmatprep.subr.bf16.mxu0 %v3207_v18  ;;  %2628 = vmatprep.subr.bf16.mxu1 %v3210_v22 }
 0x5b9   :  { %2598 = vmatpush1.bf16.msra.mxu0 %v3216_v25  ;;  %2630 = vmatpush1.bf16.msra.mxu1 %v3220_v27 }
 0x5ba   :  { %2632 = vmatprep.subr.bf16.mxu0 %v3093_v38  ;;  %2664 = vmatprep.subr.bf16.mxu1 %v3095_v41 }
 0x66f   :  { %v1453_v11 = vpop.f32.mrb[10].mxu0  ;;  %v1524_v30 = vpop.f32.mrb[10].mxu1 }
 0x670   :  { %v2729_v31 = vadd.f32 %v1453_v11, %v3267_v37  ;;  %v1455_v33 = vpop.f32.mrb[11].mxu0  ;;  %v1526_v34 = vpop.f32.mrb[11].mxu1  ;;  %v2745_v38 = vadd.f32 %v1524_v30, %v3276_v2 }
 0x671   :  { %v2730_v35 = vadd.f32 %v1455_v33, %v3269_v39  ;;  %v2746_v43 = vadd.f32 %v1526_v34, %v3271_v42  ;;  %v1926_v33 = vld [vmem:[%s3596_s4] sm:$0xff]  ;;  %v1927_v34 = vld [vmem:[%s3596_s4 + $0x8] sm:$0xff] }
 0x672   :  { %v2051_v46 = vmul.f32 -1.442695, %v2729_v31  ;;  %v2053_v59 = vmul.f32 -1.442695, %v2745_v38  ;;  %v1930_v38 = vld [vmem:[%s3596_s4 + $0x20] sm:$0xff] }
 0x673   :  { %v2052_v49 = vmul.f32 -1.442695, %v2730_v35  ;;  %v2054_v51 = vmul.f32 -1.442695, %v2746_v43  ;;  %v2696_v35 = vpack.c.bf16 %v1927_v34, %v1926_v33  ;;  %v3011_v43 = vmov 0.0|0.0  }
 0x674   :  { %2881 = vpow2.f32 %v2051_v46  ;;  %v1928_v46 = vld [vmem:[%s3596_s4 + $0x10] sm:$0xff] }
 0x675   :  { %2883 = vpow2.f32 %v2052_v49  ;;  %v1929_v49 = vld [vmem:[%s3596_s4 + $0x18] sm:$0xff] }
 0x676   :  { %2885 = vpow2.f32 %v2054_v51  ;;  %v2699_v51 = vpack.c.bf16 %v1929_v49, %v1928_v46 }
 0x67e   :  { %v2882_v52 = vpop.eup %2881 }
 0x67f   :  { %v2884_v41 = vpop.eup %2883  ;;  %v1545_v5 = vadd.f32 1.0, %v2882_v52  ;;  %v1931_v52 = vld [vmem:[%s3596_s4 + $0x28] sm:$0xff] }
 0x680   :  { %v2886_v57 = vpop.eup %2885  ;;  %v1546_v61 = vadd.f32 1.0, %v2884_v41  ;;  %v2702_v41 = vpack.c.bf16 %v1931_v52, %v1930_v38 }
 0x681   :  { %v1548_v45 = vadd.f32 1.0, %v2886_v57  ;;  %v1932_v57 = vld [vmem:[%s3596_s4 + $0x30] sm:$0xff] }
 0x683   :  { %2887 = vrcp.f32 %v1548_v45  ;;  %v1934_v45 = vld [vmem:[%s3596_s4 + $0x40] sm:$0xff] }
 0x684   :  { %2889 = vpow2.f32 %v2053_v59  ;;  %v1933_v59 = vld [vmem:[%s3596_s4 + $0x38] sm:$0xff] }
 0x685   :  { %2891 = vrcp.f32 %v1546_v61  ;;  %v2705_v61 = vpack.c.bf16 %v1933_v59, %v1932_v57 }
 0x686   :  { %2893 = vrcp.f32 %v1545_v5  ;;  %v1935_v5 = vld [vmem:[%s3596_s4 + $0x48] sm:$0xff] }
 0x68d   :  { %v2888_v7 = vpop.eup %2887 }
 0x68e   :  { %v2890_v8 = vpop.eup %2889  ;;  %v1557_v55 = vmul.f32 2.0, %v2888_v7  ;;  %v2708_v7 = vpack.c.bf16 %v1935_v5, %v1934_v45 }
 0x68f   :  { %v2892_v12 = vpop.eup %2891  ;;  %v1547_v1 = vadd.f32 1.0, %v2890_v8  ;;  %v1936_v8 = vld [vmem:[%s3596_s4 + $0x50] sm:$0xff] }
 0x690   :  { %v2055_v15 = vadd.f32 -1.0, %v1557_v55  ;;  %v2894_v17 = vpop.eup %2893  ;;  %v1559_v21 = vmul.f32 %v2892_v12, %v3447_v20  ;;  %v1937_v55 = vld [vmem:[%s3596_s4 + $0x58] sm:$0xff] }
 0x691   :  { %2895 = vrcp.f32 %v1547_v1  ;;  %v2711_v12 = vpack.c.bf16 %v1937_v55, %v1936_v8 }
 0x692   :  { %v1560_v24 = vmul.f32 %v2894_v17, %v2055_v15  ;;  %v1938_v15 = vld [vmem:[%s3596_s4 + $0x60] sm:$0xff]  ;;  %v1939_v17 = vld [vmem:[%s3596_s4 + $0x68] sm:$0xff] }
 0x693   :  { %v2714_v1 = vpack.c.bf16 %v1939_v17, %v1938_v15 }
 0x694   :  { %v3489_v28 = vadd.f32 %v1560_v24, %v1559_v21  ;;  %v1940_v21 = vld [vmem:[%s3596_s4 + $0x70] sm:$0xff]  ;;  %v1941_v24 = vld [vmem:[%s3596_s4 + $0x78] sm:$0xff] }
 0x696   :  { %2897 = vtanh.f32 %v3489_v28 }
 0x69b   :  { %v2896_v11 = vpop.eup %2895 }
 0x6a0   :  { %v2898_v30 = vpop.eup %2897 }
 0x6a1   :  { %v1563_v31 = vmul.f32 %v2898_v30, %v2896_v11 }
 0x6a3   :  { %1633 = vmatmul.mubr.f32.vlgmr.msra.gmra.mrb[12].mxu0 %v1563_v31  ;;  %1704 = vmatmul.mubr.f32.vlgmr.msra.gmra.mrb[12].mxu1 %v1563_v31 }
 0x6a4   :  { %2634 = vmatpush1.bf16.msra.mxu0 %v3100_v47  ;;  %2666 = vmatpush1.bf16.msra.mxu1 %v3103_v50 }
 0x6a5   :  { %2636 = vmatprep.subr.bf16.mxu0 %v3106_v53  ;;  %2668 = vmatprep.subr.bf16.mxu1 %v3108_v56 }
 0x6a6   :  { %1813 = vmatprep.mubr.f32.mxu0 %v3010_v0  ;;  %1884 = vmatprep.mubr.f32.mxu1 %v3010_v0 }
 0x6a8   :  { %2638 = vmatpush1.bf16.msra.mxu0 %v3114_v60  ;;  %2670 = vmatpush1.bf16.msra.mxu1 %v3118_v63 }
 0x6a9   :  { %2640 = vmatprep.subr.bf16.mxu0 %v3122_v3  ;;  %2672 = vmatprep.subr.bf16.mxu1 %v3125_v6 }
 0x6ac   :  { %2642 = vmatpush1.bf16.msra.mxu0 %v3131_v10  ;;  %2674 = vmatpush1.bf16.msra.mxu1 %v3135_v13 }
 0x6ad   :  { %2644 = vmatprep.subr.bf16.mxu0 %v3139_v16  ;;  %2676 = vmatprep.subr.bf16.mxu1 %v3142_v19 }
 0x6b0   :  { %2646 = vmatpush1.bf16.msra.mxu0 %v3148_v23  ;;  %2678 = vmatpush1.bf16.msra.mxu1 %v3152_v26 }
 0x6b1   :  { %2648 = vmatprep.subr.bf16.mxu0 %v3156_v29  ;;  %2680 = vmatprep.subr.bf16.mxu1 %v3159_v32 }
 0x6b4   :  { %2650 = vmatpush1.bf16.msra.mxu0 %v3165_v36  ;;  %2682 = vmatpush1.bf16.msra.mxu1 %v3169_v40 }
 0x6b5   :  { %2652 = vmatprep.subr.bf16.mxu0 %v3173_v44  ;;  %2684 = vmatprep.subr.bf16.mxu1 %v3176_v48 }
 0x6b8   :  { %2654 = vmatpush1.bf16.msra.mxu0 %v3182_v54  ;;  %2686 = vmatpush1.bf16.msra.mxu1 %v3186_v58 }
 0x6b9   :  { %2656 = vmatprep.subr.bf16.mxu0 %v3190_v62  ;;  %2688 = vmatprep.subr.bf16.mxu1 %v3193_v4 }
 0x6bc   :  { %2658 = vmatpush1.bf16.msra.mxu0 %v3199_v9  ;;  %2690 = vmatpush1.bf16.msra.mxu1 %v3203_v14 }
 0x6bd   :  { %2660 = vmatprep.subr.bf16.mxu0 %v3207_v18  ;;  %2692 = vmatprep.subr.bf16.mxu1 %v3210_v22 }
 0x6c0   :  { %2662 = vmatpush1.bf16.msra.mxu0 %v3216_v25  ;;  %2694 = vmatpush1.bf16.msra.mxu1 %v3220_v27 }
 0x6c1   :  { %2695 = vmatprep.subr.bf16.mxu0 %v3011_v43 }
 0x776   :  { %v1634_v47 = vpop.f32.mrb[12].mxu0  ;;  %v1705_v50 = vpop.f32.mrb[12].mxu1 }
 0x777   :  { %v2731_v53 = vadd.f32 %v1634_v47, %v3267_v37  ;;  %v1636_v56 = vpop.f32.mrb[13].mxu0  ;;  %v1707_v60 = vpop.f32.mrb[13].mxu1  ;;  %v2747_v16 = vadd.f32 %v1705_v50, %v3276_v2 }
 0x778   :  { %v2732_v63 = vadd.f32 %v1636_v56, %v3269_v39  ;;  %v2748_v3 = vadd.f32 %v1707_v60, %v3271_v42 }
 0x779   :  { %v2056_v6 = vmul.f32 -1.442695, %v2731_v53  ;;  %v2058_v29 = vmul.f32 -1.442695, %v2747_v16 }
 0x77a   :  { %v2057_v10 = vmul.f32 -1.442695, %v2732_v63  ;;  %v2059_v13 = vmul.f32 -1.442695, %v2748_v3 }
 0x77b   :  { %2899 = vpow2.f32 %v2056_v6 }
 0x77c   :  { %2901 = vpow2.f32 %v2057_v10 }
 0x77d   :  { %2903 = vpow2.f32 %v2059_v13 }
 0x785   :  { %v2900_v19 = vpop.eup %2899 }
 0x786   :  { %v2902_v23 = vpop.eup %2901  ;;  %v1726_v40 = vadd.f32 1.0, %v2900_v19 }
 0x787   :  { %v2904_v26 = vpop.eup %2903  ;;  %v1727_v32 = vadd.f32 1.0, %v2902_v23 }
 0x788   :  { %v1729_v36 = vadd.f32 1.0, %v2904_v26 }
 0x78a   :  { %2905 = vrcp.f32 %v1729_v36 }
 0x78b   :  { %2907 = vpow2.f32 %v2058_v29 }
 0x78c   :  { %2909 = vrcp.f32 %v1727_v32 }
 0x78d   :  { %2911 = vrcp.f32 %v1726_v40 }
 0x794   :  { %v2906_v44 = vpop.eup %2905 }
 0x795   :  { %v2908_v48 = vpop.eup %2907  ;;  %v1738_v54 = vmul.f32 2.0, %v2906_v44 }
 0x796   :  { %v2910_v58 = vpop.eup %2909  ;;  %v1728_v9 = vadd.f32 1.0, %v2908_v48 }
 0x797   :  { %v2060_v62 = vadd.f32 -1.0, %v1738_v54  ;;  %v2912_v4 = vpop.eup %2911  ;;  %v1740_v14 = vmul.f32 %v2910_v58, %v3489_v28  ;;  %v2717_v28 = vpack.c.bf16 %v1941_v24, %v1940_v21 }
 0x798   :  { %2913 = vrcp.f32 %v1728_v9 }
 0x799   :  { %v1741_v18 = vmul.f32 %v2912_v4, %v2060_v62  ;;  %v2066_v4 = vld [vmem:[%s3597_s5] ss:$0 sm:$0xff] }
 0x79b   :  { %v3529_v22 = vadd.f32 %v1741_v18, %v1740_v14 }
 0x79d   :  { %2915 = vtanh.f32 %v3529_v22 }
 0x7a2   :  { %v2914_v25 = vpop.eup %2913 }
 0x7a7   :  { %v2916_v27 = vpop.eup %2915 }
 0x7a8   :  { %v1744_v20 = vmul.f32 %v2916_v27, %v2914_v25 }
 0x7aa   :  { %1814 = vmatmul.mubr.f32.vlgmr.msra.gmra.mrb[14].mxu0 %v1744_v20  ;;  %1885 = vmatmul.mubr.f32.vlgmr.msra.gmra.mrb[14].mxu1 %v1744_v20 }
 0x7ab   :  { %2697 = vmatpush3.bf16.msra.mxu0 %v2696_v35  ;;  %2116 = vmatprep.mubr.msk.f32.mxu0 %vm3012_vm0, %v3010_v0 }
 0x7ac   :  { %2698 = vmatprep.subr.bf16.mxu0 %v3011_v43 }
 0x7af   :  { %2700 = vmatpush3.bf16.msra.mxu0 %v2699_v51 }
 0x7b0   :  { %2701 = vmatprep.subr.bf16.mxu0 %v3011_v43 }
 0x7b3   :  { %2703 = vmatpush3.bf16.msra.mxu0 %v2702_v41 }
 0x7b4   :  { %2704 = vmatprep.subr.bf16.mxu0 %v3011_v43 }
 0x7b7   :  { %2706 = vmatpush3.bf16.msra.mxu0 %v2705_v61 }
 0x7b8   :  { %2707 = vmatprep.subr.bf16.mxu0 %v3011_v43 }
 0x7bb   :  { %2709 = vmatpush3.bf16.msra.mxu0 %v2708_v7 }
 0x7bc   :  { %2710 = vmatprep.subr.bf16.mxu0 %v3011_v43 }
 0x7bf   :  { %2712 = vmatpush3.bf16.msra.mxu0 %v2711_v12 }
 0x7c0   :  { %2713 = vmatprep.subr.bf16.mxu0 %v3011_v43 }
 0x7c3   :  { %2715 = vmatpush3.bf16.msra.mxu0 %v2714_v1 }
 0x7c4   :  { %2716 = vmatprep.subr.bf16.mxu0 %v3011_v43 }
 0x7c7   :  { %2718 = vmatpush3.bf16.msra.mxu0 %v2717_v28 }
 0x87d   :  { %v1815_v11 = vpop.f32.mrb[14].mxu0  ;;  %v1886_v30 = vpop.f32.mrb[14].mxu1 }
 0x87e   :  { %v2733_v31 = vadd.f32 %v1815_v11, %v3267_v37  ;;  %v1817_v0 = vpop.f32.mrb[15].mxu0  ;;  %v1888_v47 = vpop.f32.mrb[15].mxu1  ;;  %v2749_v3 = vadd.f32 %v1886_v30, %v3276_v2 }
 0x87f   :  { %v2734_v50 = vadd.f32 %v1817_v0, %v3269_v39  ;;  %v2750_v53 = vadd.f32 %v1888_v47, %v3271_v42 }
 0x880   :  { %v2061_v56 = vmul.f32 -1.442695, %v2733_v31  ;;  %v2063_v16 = vmul.f32 -1.442695, %v2749_v3 }
 0x881   :  { %v2062_v60 = vmul.f32 -1.442695, %v2734_v50  ;;  %v2064_v63 = vmul.f32 -1.442695, %v2750_v53 }
 0x882   :  { %2917 = vpow2.f32 %v2061_v56 }
 0x883   :  { %2919 = vpow2.f32 %v2062_v60 }
 0x884   :  { %2921 = vpow2.f32 %v2064_v63 }
 0x88c   :  { %v2918_v6 = vpop.eup %2917 }
 0x88d   :  { %v2920_v10 = vpop.eup %2919  ;;  %v1907_v23 = vadd.f32 1.0, %v2918_v6 }
 0x88e   :  { %v2922_v13 = vpop.eup %2921  ;;  %v1908_v19 = vadd.f32 1.0, %v2920_v10 }
 0x88f   :  { %v1910_v37 = vadd.f32 1.0, %v2922_v13 }
 0x891   :  { %2923 = vrcp.f32 %v1910_v37 }
 0x892   :  { %2925 = vpow2.f32 %v2063_v16 }
 0x893   :  { %2927 = vrcp.f32 %v1908_v19 }
 0x894   :  { %2929 = vrcp.f32 %v1907_v23 }
 0x89b   :  { %v2924_v39 = vpop.eup %2923 }
 0x89c   :  { %v2926_v42 = vpop.eup %2925  ;;  %v1919_v26 = vmul.f32 2.0, %v2924_v39 }
 0x89d   :  { %v2928_v29 = vpop.eup %2927  ;;  %v1909_v40 = vadd.f32 1.0, %v2926_v42 }
 0x89e   :  { %v2065_v32 = vadd.f32 -1.0, %v1919_v26  ;;  %v2930_v36 = vpop.eup %2929  ;;  %v1921_v2 = vmul.f32 %v2928_v29, %v3529_v22 }
 0x89f   :  { %2931 = vrcp.f32 %v1909_v40 }
 0x8a0   :  { %v1922_v44 = vmul.f32 %v2930_v36, %v2065_v32 }
 0x8a2   :  { %v1923_v48 = vadd.f32 %v1922_v44, %v1921_v2 }
 0x8a4   :  { %2933 = vtanh.f32 %v1923_v48 }
 0x8a9   :  { %v2932_v54 = vpop.eup %2931 }
 0x8ae   :  { %v2934_v58 = vpop.eup %2933 }
 0x8af   :  { %v1925_v62 = vmul.f32 %v2934_v58, %v2932_v54 }
 0x8b1   :  { %2117 = vmatmul.mubr.f32.vlgmr.msra.gmra.mrb[16].mxu0 %v1925_v62 }
 0x984   :  { %v2015_v9 = vpop.f32.mrb[16].mxu0 }
 0x985   :  { %v2016_v14 = vadd.f32 %v2066_v4, %v2015_v9  ;;  %v2118_v18 = vpop.f32.mrb[17].mxu0 }
 0x987   :  { %2019 = vst [vmem:[%s3598_s6] sm:$0xff] %v2016_v14 }
 0x988   :  { %2024 = vsyncpa [#allocation4], 1 }
 0x989   :  { %2025 = vsyncpa [#allocation6], 1 }

</bundles_post_ra>
